<compile_context>
chip_gen: v5e
topology: v5e:2x2
jax: 0.10.0
libtpu: 0.0.40
codegen_flags: <defaults>
</compile_context>

<pallas_src>
import functools
import math

import jax
import jax.numpy as jnp
from jax.experimental import pallas as pl
from jax.experimental.pallas import tpu as pltpu


# ----------------------------------------------------------------------------
# Tiling helpers
# ----------------------------------------------------------------------------

def _choose_tiling(n, per_row_bytes, resident_bytes, *, max_tm=2048,
                   budget=24 * 2 ** 20):
    """Pick a sublane-aligned node tile from a VMEM budget.

    per_row_bytes should already include the x2 double-buffer factor for the
    streamed tiles; resident_bytes the (conservatively x2) weight residency.
    Returns (tm, vmem_limit_bytes_or_None)."""
    avail = max(budget - resident_bytes, 2 * 2 ** 20)
    tm = int(avail // max(per_row_bytes, 1))
    tm = min(tm, max_tm)
    n_cap = ((n + 7) // 8) * 8
    tm = min(tm, n_cap)
    tm = max(8, (tm // 8) * 8)
    # Prefer >= 2 grid steps (pipelining + v7x megacore) whenever n allows.
    if n_cap > 8 and tm >= n_cap:
        tm = max(8, (((n_cap + 1) // 2 + 7) // 8) * 8)
    est = resident_bytes + tm * per_row_bytes
    vmem_limit = None
    if est > 12 * 2 ** 20:
        # Never below any generation default (16 MiB v5e / 32 MiB v6e+v7x),
        # never above what v7x's 64 MiB physical VMEM can comfortably give.
        vmem_limit = int(min(max(32 * 2 ** 20, est * 3 // 2), 50 * 2 ** 20))
    return tm, vmem_limit


def _full_block_spec(arr):
    """Whole-array block, resident across the node grid (index map -> zeros)."""
    nd = arr.ndim
    return pl.BlockSpec(tuple(arr.shape), lambda i, _nd=nd: (0,) * _nd)


# ----------------------------------------------------------------------------
# Kernel 1: all hops fused
#   per hop:  x_flat @ W1' (+agg fold) + b1 -> BN affine -> PReLU -> @W2 + b2
#             -> SIGN PReLU -> @ Wlr_slice   ; summed over hops.
# ----------------------------------------------------------------------------

def _hop_fused_kernel(*refs, num_hops, has_hidden):
    o_ref = refs[-1]
    a_outer = refs[-2][...]                     # (1, 1)   SIGN-level PReLU alpha
    a_hops = refs[-3][...]                      # (1, H)   per-hop FFN PReLU alphas
    feat_refs = refs[:num_hops]
    per = 7 if has_hidden else 3

    acc = None
    for h in range(num_hops):
        base = num_hops + h * per
        w1_ref = refs[base]
        b1 = refs[base + 1][...]                # (1, hidden) f32
        if has_hidden:
            sc1 = refs[base + 2][...]
            sh1 = refs[base + 3][...]
            w2_ref = refs[base + 4]
            b2 = refs[base + 5][...]
            wlr_ref = refs[base + 6]
        else:
            wlr_ref = refs[base + 2]

        x = feat_refs[h][...].astype(jnp.bfloat16)          # (tm, S*F)
        z = jnp.dot(x, w1_ref[...],
                    preferred_element_type=jnp.float32) + b1
        if has_hidden:
            z = z * sc1 + sh1                                # folded eval BN
            a_h = a_hops[:, h:h + 1]                         # (1, 1) static slice
            z = jnp.where(z >= 0.0, z, a_h * z)              # hop-FFN PReLU
            z = jnp.dot(z.astype(jnp.bfloat16), w2_ref[...],
                        preferred_element_type=jnp.float32) + b2
        z = jnp.where(z >= 0.0, z, a_outer * z)              # SIGN PReLU (on concat)
        p = jnp.dot(z.astype(jnp.bfloat16), wlr_ref[...],
                    preferred_element_type=jnp.float32)      # lr layer-0 K-slice
        acc = p if acc is None else acc + p

    o_ref[...] = acc.astype(o_ref.dtype)


def _hop_fused_call(feats_flat, prep):
    num_hops = prep["num_hops"]
    has_hidden = prep["has_hidden"]
    n, sf = feats_flat[0].shape
    hidden = prep["hop"][0]["W1p"].shape[1]
    hidden_lr = prep["hop"][0]["Wlr"].shape[1]

    resident = 0
    for hp in prep["hop"]:
        resident += hp["W1p"].size * 2 + hp["Wlr"].size * 2
        if has_hidden:
            resident += hp["W2"].size * 2
    resident *= 2                                   # conservative double-buffer
    per_row = 2 * num_hops * sf * 4 + 2 * hidden_lr * 4 + 6 * hidden * 4
    tm, vmem_limit = _choose_tiling(n, per_row, resident)

    args = list(feats_flat)
    in_specs = [pl.BlockSpec((tm, sf), lambda i: (i, 0)) for _ in range(num_hops)]
    for hp in prep["hop"]:
        group = [hp["W1p"], hp["b1"]]
        if has_hidden:
            group += [hp["scale1"], hp["shift1"], hp["W2"], hp["b2"]]
        group += [hp["Wlr"]]
        for a in group:
            args.append(a)
            in_specs.append(_full_block_spec(a))
    args += [prep["a_hops"], prep["a_outer"]]
    in_specs += [_full_block_spec(prep["a_hops"]),
                 _full_block_spec(prep["a_outer"])]

    flops_per_row = 2 * num_hops * (sf * hidden
                                    + (hidden * hidden if has_hidden else 0)
                                    + hidden * hidden_lr)
    cost = pl.CostEstimate(
        flops=int(n * flops_per_row),
        transcendentals=0,
        bytes_accessed=int(n * num_hops * sf * 4 + resident // 2
                           + n * hidden_lr * 4))

    kernel = functools.partial(_hop_fused_kernel, num_hops=num_hops,
                               has_hidden=has_hidden)
    return pl.pallas_call(
        kernel,
        out_shape=jax.ShapeDtypeStruct((n, hidden_lr), jnp.float32),
        grid_spec=pltpu.PrefetchScalarGridSpec(
            num_scalar_prefetch=0,
            grid=(pl.cdiv(n, tm),),
            in_specs=in_specs,
            out_specs=pl.BlockSpec((tm, hidden_lr), lambda i: (i, 0)),
        ),
        compiler_params=pltpu.CompilerParams(
            dimension_semantics=("parallel",),
            vmem_limit_bytes=vmem_limit),
        cost_estimate=cost,
    )(*args)


# ----------------------------------------------------------------------------
# Kernel 2: lr_output tail
#   pre: +bias_{j-1}, BN affine_{j-1}, PReLU  ->  @W_j  (+bias_j, log_softmax on last)
# ----------------------------------------------------------------------------

def _head_linear_kernel(x_ref, w_ref, pre_b_ref, pre_sc_ref, pre_sh_ref,
                        pre_a_ref, post_b_ref, o_ref, *,
                        apply_post_bias, apply_log_softmax):
    x = x_ref[...].astype(jnp.float32)
    x = x + pre_b_ref[...]                          # previous layer's deferred bias
    x = x * pre_sc_ref[...] + pre_sh_ref[...]       # folded eval BN
    a = pre_a_ref[...]
    x = jnp.where(x >= 0.0, x, a * x)               # lr-FFN PReLU

    z = jnp.dot(x.astype(jnp.bfloat16), w_ref[...],
                preferred_element_type=jnp.float32)
    if apply_post_bias:
        z = z + post_b_ref[...]
    if apply_log_softmax:
        m = jnp.max(z, axis=-1, keepdims=True)
        zs = z - m
        lse = jnp.log(jnp.sum(jnp.exp(zs), axis=-1, keepdims=True))
        z = zs - lse
    o_ref[...] = z.astype(o_ref.dtype)


def head_linear(x, w_bf16, *, pre_b, pre_sc, pre_sh, pre_a, post_b,
                log_softmax):
    n, f_in = x.shape
    f_out = w_bf16.shape[1]
    apply_post_bias = post_b is not None
    if post_b is None:
        post_b = jnp.zeros((1, f_out), jnp.float32)

    resident = 2 * (w_bf16.size * 2 + (3 * f_in + f_out + 1) * 4)
    per_row = 2 * f_in * 4 + 2 * f_out * 4 + 2 * f_in * 4
    tm, vmem_limit = _choose_tiling(n, per_row, resident)

    cost = pl.CostEstimate(
        flops=2 * n * f_in * f_out,
        transcendentals=(n * f_out) if log_softmax else 0,
        bytes_accessed=int(n * f_in * 4 + resident // 2 + n * f_out * 4))

    kernel = functools.partial(_head_linear_kernel,
                               apply_post_bias=apply_post_bias,
                               apply_log_softmax=log_softmax)
    small = [w_bf16, pre_b, pre_sc, pre_sh, pre_a, post_b]
    return pl.pallas_call(
        kernel,
        out_shape=jax.ShapeDtypeStruct((n, f_out), jnp.float32),
        grid_spec=pltpu.PrefetchScalarGridSpec(
            num_scalar_prefetch=0,
            grid=(pl.cdiv(n, tm),),
            in_specs=[pl.BlockSpec((tm, f_in), lambda i: (i, 0))]
                     + [_full_block_spec(a) for a in small],
            out_specs=pl.BlockSpec((tm, f_out), lambda i: (i, 0)),
        ),
        compiler_params=pltpu.CompilerParams(
            dimension_semantics=("parallel",),
            vmem_limit_bytes=vmem_limit),
        cost_estimate=cost,
    )(x, *small)


# ----------------------------------------------------------------------------
# Parameter preparation: fold the aggregator into W1, split lr W0 along K,
# pre-cast matmul weights to bf16, reshape small vectors to (1, d) f32.
# ----------------------------------------------------------------------------

def prepare_sign_params(params):
    num_hops = len(params["agg_weights"])
    n_layers_1 = len(params["fc_layers"][0]["layers"])
    n_layers_2 = len(params["lr_output"]["layers"])
    assert n_layers_1 in (1, 2), "fused path supports n_layers_1 in {1, 2}"
    assert n_layers_2 >= 2, "fused path supports n_layers_2 >= 2"
    has_hidden = n_layers_1 >= 2

    lr_layers = params["lr_output"]["layers"]
    hidden_per_hop = params["fc_layers"][0]["layers"][-1]["W"].shape[1]
    w_lr0 = lr_layers[0]["W"]                        # (num_hops*hidden, hidden_lr)

    hop, a_hops = [], []
    for h in range(num_hops):
        ffn = params["fc_layers"][h]
        agg = params["agg_weights"][h]               # (S, F)
        w1 = ffn["layers"][0]["W"]                   # (F, hidden)
        s, f = agg.shape
        w1p = (agg[:, :, None] * w1[None, :, :]).reshape(s * f, -1)
        entry = {
            "W1p": w1p.astype(jnp.bfloat16),
            "b1": ffn["layers"][0]["b"].reshape(1, -1).astype(jnp.float32),
            "Wlr": w_lr0[h * hidden_per_hop:(h + 1) * hidden_per_hop, :]
                   .astype(jnp.bfloat16),
        }
        if has_hidden:
            entry["scale1"] = ffn["layers"][0]["scale"].reshape(1, -1).astype(jnp.float32)
            entry["shift1"] = ffn["layers"][0]["shift"].reshape(1, -1).astype(jnp.float32)
            entry["W2"] = ffn["layers"][1]["W"].astype(jnp.bfloat16)
            entry["b2"] = ffn["layers"][1]["b"].reshape(1, -1).astype(jnp.float32)
        hop.append(entry)
        a_hops.append(float(ffn["prelu_a"]))

    lr = {
        "W": [None] + [l["W"].astype(jnp.bfloat16) for l in lr_layers[1:]],
        "b": [l["b"].reshape(1, -1).astype(jnp.float32) for l in lr_layers],
        "scale": [l["scale"].reshape(1, -1).astype(jnp.float32)
                  if "scale" in l else None for l in lr_layers],
        "shift": [l["shift"].reshape(1, -1).astype(jnp.float32)
                  if "shift" in l else None for l in lr_layers],
        "a": jnp.asarray(float(params["lr_output"]["prelu_a"]),
                         jnp.float32).reshape(1, 1),
    }

    return {
        "num_hops": num_hops,
        "has_hidden": has_hidden,
        "hop": hop,
        "a_hops": jnp.asarray(a_hops, jnp.float32).reshape(1, num_hops),
        "a_outer": jnp.asarray(float(params["prelu_a"]),
                               jnp.float32).reshape(1, 1),
        "lr": lr,
    }


def sign_forward(feats, prep):
    """SIGNV1.forward (inference) using the two fused Pallas kernels."""
    n, s, f = feats[0].shape
    feats_flat = [jnp.reshape(ft, (n, s * f)) for ft in feats]
    x = _hop_fused_call(feats_flat, prep)            # (N, hidden_lr) pre-bias acc
    lr = prep["lr"]
    m = len(lr["W"])
    for j in range(1, m):
        last = (j == m - 1)
        x = head_linear(
            x, lr["W"][j],
            pre_b=lr["b"][j - 1], pre_sc=lr["scale"][j - 1],
            pre_sh=lr["shift"][j - 1], pre_a=lr["a"],
            post_b=lr["b"][j] if last else None,
            log_softmax=last)
    return x


# ----------------------------------------------------------------------------
# References
# ----------------------------------------------------------------------------

def sign_ref_matched(feats, prep):
    """Mirrors the kernel math exactly (fold + bf16 operands) -> tight check."""
    num_hops, has_hidden = prep["num_hops"], prep["has_hidden"]
    n, s, f = feats[0].shape
    acc = None
    for h in range(num_hops):
        hp = prep["hop"][h]
        x = feats[h].reshape(n, s * f).astype(jnp.bfloat16)
        z = jnp.dot(x, hp["W1p"], preferred_element_type=jnp.float32) + hp["b1"]
        if has_hidden:
            z = z * hp["scale1"] + hp["shift1"]
            a_h = prep["a_hops"][:, h:h + 1]
            z = jnp.where(z >= 0.0, z, a_h * z)
            z = jnp.dot(z.astype(jnp.bfloat16), hp["W2"],
                        preferred_element_type=jnp.float32) + hp["b2"]
        z = jnp.where(z >= 0.0, z, prep["a_outer"] * z)
        p = jnp.dot(z.astype(jnp.bfloat16), hp["Wlr"],
                    preferred_element_type=jnp.float32)
        acc = p if acc is None else acc + p
    x = acc
    lr = prep["lr"]
    m = len(lr["W"])
    for j in range(1, m):
        last = (j == m - 1)
        x = x + lr["b"][j - 1]
        x = x * lr["scale"][j - 1] + lr["shift"][j - 1]
        x = jnp.where(x >= 0.0, x, lr["a"] * x)
        x = jnp.dot(x.astype(jnp.bfloat16), lr["W"][j],
                    preferred_element_type=jnp.float32)
        if last:
            x = x + lr["b"][j]
            x = jax.nn.log_softmax(x, axis=-1)
    return x


def _prelu(x, a):
    return jnp.where(x >= 0.0, x, a * x)


def _ffn_ref(x, ffn):
    layers = ffn["layers"]
    n = len(layers)
    for i, lyr in enumerate(layers):
        x = jnp.dot(x, lyr["W"], precision=jax.lax.Precision.HIGHEST) + lyr["b"]
        if i < n - 1:
            x = x * lyr["scale"] + lyr["shift"]
            x = _prelu(x, ffn["prelu_a"])
    return x


def sign_ref_spec(feats, params):
    """Literal PyTorch-eval-semantics reference in f32 -> loose sanity check."""
    hidden = []
    for ft, agg, ffn in zip(feats, params["agg_weights"], params["fc_layers"]):
        nf = jnp.sum(ft * agg[None, :, :], axis=1)
        hidden.append(_ffn_ref(nf, ffn))
    h = jnp.concatenate(hidden, axis=-1)
    h = _prelu(h, params["prelu_a"])
    out = _ffn_ref(h, params["lr_output"])
    return jax.nn.log_softmax(out, axis=-1)


# ----------------------------------------------------------------------------
# Parameter construction (xavier init + nontrivial bias/BN so every fused path
# is exercised; BatchNorm folded to eval-mode affine)
# ----------------------------------------------------------------------------

def _xavier_uniform(key, fan_in, fan_out, gain):
    a = gain * math.sqrt(6.0 / (fan_in + fan_out))
    return jax.random.uniform(key, (fan_in, fan_out), jnp.float32, -a, a)


def init_sign_params(key, *, subset_dim, feat_dim, hidden, nclass, num_hops,
                     n_layers_1, n_layers_2):
    gain = math.sqrt(2.0)  # nn.init.calculate_gain('relu')
    keys = iter(jax.random.split(key, 512))
    nxt = lambda: next(keys)  # noqa: E731

    def make_ffn(f_in, hid, f_out, n_layers):
        if n_layers == 1:
            dims = [(f_in, f_out)]
        else:
            dims = [(f_in, hid)] + [(hid, hid)] * (n_layers - 2) + [(hid, f_out)]
        layers = []
        for li, (di, do) in enumerate(dims):
            lyr = {"W": _xavier_uniform(nxt(), di, do, gain),
                   "b": 0.01 * jax.random.normal(nxt(), (do,), jnp.float32)}
            if li < len(dims) - 1:
                gamma = 1.0 + 0.1 * jax.random.normal(nxt(), (do,), jnp.float32)
                beta = 0.1 * jax.random.normal(nxt(), (do,), jnp.float32)
                mean = 0.1 * jax.random.normal(nxt(), (do,), jnp.float32)
                var = jnp.abs(1.0 + 0.1 * jax.random.normal(nxt(), (do,), jnp.float32))
                scale = gamma / jnp.sqrt(var + 1e-5)       # eval-mode BN folded
                lyr["scale"] = scale
                lyr["shift"] = beta - mean * scale
            layers.append(lyr)
        return {"layers": layers, "prelu_a": 0.25}          # PReLU default init

    return {
        "agg_weights": [_xavier_uniform(nxt(), subset_dim, feat_dim, 1.0)
                        for _ in range(num_hops)],
        "fc_layers": [make_ffn(feat_dim, hidden, hidden, n_layers_1)
                      for _ in range(num_hops)],
        "lr_output": make_ffn(num_hops * hidden, hidden, nclass, n_layers_2),
        "prelu_a": 0.25,
    }


# ----------------------------------------------------------------------------
# Smoke test
# ----------------------------------------------------------------------------

if __name__ == "__main__":
    N, subset_dim, feat_dim = 256, 4, 32
    hidden, nclass, num_hops = 32, 10, 3
    n_layers_1, n_layers_2 = 2, 2

    key = jax.random.PRNGKey(0)
    kf, kp = jax.random.split(key)
    feat_keys = jax.random.split(kf, num_hops)
    feats = [jax.random.normal(k, (N, subset_dim, feat_dim), jnp.float32)
             for k in feat_keys]
    params = init_sign_params(kp, subset_dim=subset_dim, feat_dim=feat_dim,
                              hidden=hidden, nclass=nclass, num_hops=num_hops,
                              n_layers_1=n_layers_1, n_layers_2=n_layers_2)
    prep = prepare_sign_params(params)

    out = jax.block_until_ready(sign_forward(feats, prep))
    assert out.shape == (N, nclass)
    assert bool(jnp.isfinite(out).all())

    # 1) Matched-precision reference (same agg fold + bf16 operands, f32 acc).
    ref_m = sign_ref_matched(feats, prep)
    err_m = float(jnp.max(jnp.abs(out - ref_m)))
    assert err_m < 2e-3, err_m

    # 2) Literal module semantics in f32 (loose: bf16 operand rounding).
    ref_s = sign_ref_spec(feats, params)
    err_s = float(jnp.max(jnp.abs(out - ref_s)))
    assert err_s < 2e-1, err_s

    # 3) Valid log-probabilities.
    assert bool(jnp.allclose(jnp.sum(jnp.exp(out), axis=-1), 1.0, atol=1e-3))

    print("KERNEL_OK")
</pallas_src>

<mosaic_0001>
module attributes {stable_mosaic.version = 11 : i64} {
  func.func @_hop_fused_kernel(%arg0: i32, %arg1: memref<128x128xf32, #tpu.memory_space<vmem>>, %arg2: memref<128x128xf32, #tpu.memory_space<vmem>>, %arg3: memref<128x128xf32, #tpu.memory_space<vmem>>, %arg4: memref<128x32xbf16, #tpu.memory_space<vmem>>, %arg5: memref<1x32xf32, #tpu.memory_space<vmem>>, %arg6: memref<1x32xf32, #tpu.memory_space<vmem>>, %arg7: memref<1x32xf32, #tpu.memory_space<vmem>>, %arg8: memref<32x32xbf16, #tpu.memory_space<vmem>>, %arg9: memref<1x32xf32, #tpu.memory_space<vmem>>, %arg10: memref<32x32xbf16, #tpu.memory_space<vmem>>, %arg11: memref<128x32xbf16, #tpu.memory_space<vmem>>, %arg12: memref<1x32xf32, #tpu.memory_space<vmem>>, %arg13: memref<1x32xf32, #tpu.memory_space<vmem>>, %arg14: memref<1x32xf32, #tpu.memory_space<vmem>>, %arg15: memref<32x32xbf16, #tpu.memory_space<vmem>>, %arg16: memref<1x32xf32, #tpu.memory_space<vmem>>, %arg17: memref<32x32xbf16, #tpu.memory_space<vmem>>, %arg18: memref<128x32xbf16, #tpu.memory_space<vmem>>, %arg19: memref<1x32xf32, #tpu.memory_space<vmem>>, %arg20: memref<1x32xf32, #tpu.memory_space<vmem>>, %arg21: memref<1x32xf32, #tpu.memory_space<vmem>>, %arg22: memref<32x32xbf16, #tpu.memory_space<vmem>>, %arg23: memref<1x32xf32, #tpu.memory_space<vmem>>, %arg24: memref<32x32xbf16, #tpu.memory_space<vmem>>, %arg25: memref<1x3xf32, #tpu.memory_space<vmem>>, %arg26: memref<1x1xf32, #tpu.memory_space<vmem>>, %arg27: memref<128x32xf32, #tpu.memory_space<vmem>>) attributes {dimension_semantics = [#tpu.dimension_semantics<parallel>], iteration_bounds = array<i64: 2>, scalar_prefetch = 0 : i64, scratch_operands = 0 : i64, tpu.core_type = #tpu.core_type<tc>, window_params = [{transform_indices = @transform_0, window_bounds = array<i64: 128, 128>}, {transform_indices = @transform_1, window_bounds = array<i64: 128, 128>}, {transform_indices = @transform_2, window_bounds = array<i64: 128, 128>}, {pipeline_mode = #tpu.pipeline_mode<synchronous>, transform_indices = @transform_3, window_bounds = array<i64: 128, 32>}, {pipeline_mode = #tpu.pipeline_mode<synchronous>, transform_indices = @transform_4, window_bounds = array<i64: 1, 32>}, {pipeline_mode = #tpu.pipeline_mode<synchronous>, transform_indices = @transform_5, window_bounds = array<i64: 1, 32>}, {pipeline_mode = #tpu.pipeline_mode<synchronous>, transform_indices = @transform_6, window_bounds = array<i64: 1, 32>}, {pipeline_mode = #tpu.pipeline_mode<synchronous>, transform_indices = @transform_7, window_bounds = array<i64: 32, 32>}, {pipeline_mode = #tpu.pipeline_mode<synchronous>, transform_indices = @transform_8, window_bounds = array<i64: 1, 32>}, {pipeline_mode = #tpu.pipeline_mode<synchronous>, transform_indices = @transform_9, window_bounds = array<i64: 32, 32>}, {pipeline_mode = #tpu.pipeline_mode<synchronous>, transform_indices = @transform_10, window_bounds = array<i64: 128, 32>}, {pipeline_mode = #tpu.pipeline_mode<synchronous>, transform_indices = @transform_11, window_bounds = array<i64: 1, 32>}, {pipeline_mode = #tpu.pipeline_mode<synchronous>, transform_indices = @transform_12, window_bounds = array<i64: 1, 32>}, {pipeline_mode = #tpu.pipeline_mode<synchronous>, transform_indices = @transform_13, window_bounds = array<i64: 1, 32>}, {pipeline_mode = #tpu.pipeline_mode<synchronous>, transform_indices = @transform_14, window_bounds = array<i64: 32, 32>}, {pipeline_mode = #tpu.pipeline_mode<synchronous>, transform_indices = @transform_15, window_bounds = array<i64: 1, 32>}, {pipeline_mode = #tpu.pipeline_mode<synchronous>, transform_indices = @transform_16, window_bounds = array<i64: 32, 32>}, {pipeline_mode = #tpu.pipeline_mode<synchronous>, transform_indices = @transform_17, window_bounds = array<i64: 128, 32>}, {pipeline_mode = #tpu.pipeline_mode<synchronous>, transform_indices = @transform_18, window_bounds = array<i64: 1, 32>}, {pipeline_mode = #tpu.pipeline_mode<synchronous>, transform_indices = @transform_19, window_bounds = array<i64: 1, 32>}, {pipeline_mode = #tpu.pipeline_mode<synchronous>, transform_indices = @transform_20, window_bounds = array<i64: 1, 32>}, {pipeline_mode = #tpu.pipeline_mode<synchronous>, transform_indices = @transform_21, window_bounds = array<i64: 32, 32>}, {pipeline_mode = #tpu.pipeline_mode<synchronous>, transform_indices = @transform_22, window_bounds = array<i64: 1, 32>}, {pipeline_mode = #tpu.pipeline_mode<synchronous>, transform_indices = @transform_23, window_bounds = array<i64: 32, 32>}, {pipeline_mode = #tpu.pipeline_mode<synchronous>, transform_indices = @transform_24, window_bounds = array<i64: 1, 3>}, {pipeline_mode = #tpu.pipeline_mode<synchronous>, transform_indices = @transform_25, window_bounds = array<i64: 1, 1>}, {transform_indices = @transform_26, window_bounds = array<i64: 128, 32>}]} {
    %c0 = arith.constant 0 : index
    %c0_0 = arith.constant 0 : index
    %0 = vector.load %arg26[%c0, %c0_0] : memref<1x1xf32, #tpu.memory_space<vmem>>, vector<1x1xf32>
    %c0_1 = arith.constant 0 : index
    %c0_2 = arith.constant 0 : index
    %1 = vector.load %arg25[%c0_1, %c0_2] : memref<1x3xf32, #tpu.memory_space<vmem>>, vector<1x3xf32>
    %c0_3 = arith.constant 0 : index
    %c0_4 = arith.constant 0 : index
    %2 = vector.load %arg5[%c0_3, %c0_4] : memref<1x32xf32, #tpu.memory_space<vmem>>, vector<1x32xf32>
    %c0_5 = arith.constant 0 : index
    %c0_6 = arith.constant 0 : index
    %3 = vector.load %arg6[%c0_5, %c0_6] : memref<1x32xf32, #tpu.memory_space<vmem>>, vector<1x32xf32>
    %c0_7 = arith.constant 0 : index
    %c0_8 = arith.constant 0 : index
    %4 = vector.load %arg7[%c0_7, %c0_8] : memref<1x32xf32, #tpu.memory_space<vmem>>, vector<1x32xf32>
    %c0_9 = arith.constant 0 : index
    %c0_10 = arith.constant 0 : index
    %5 = vector.load %arg9[%c0_9, %c0_10] : memref<1x32xf32, #tpu.memory_space<vmem>>, vector<1x32xf32>
    %c0_11 = arith.constant 0 : index
    %c0_12 = arith.constant 0 : index
    %6 = vector.load %arg1[%c0_11, %c0_12] : memref<128x128xf32, #tpu.memory_space<vmem>>, vector<128x128xf32>
    %7 = arith.truncf %6 : vector<128x128xf32> to vector<128x128xbf16>
    %c0_13 = arith.constant 0 : index
    %c0_14 = arith.constant 0 : index
    %8 = vector.load %arg4[%c0_13, %c0_14] : memref<128x32xbf16, #tpu.memory_space<vmem>>, vector<128x32xbf16>
    %cst = arith.constant dense<0.000000e+00> : vector<128x32xf32>
    %9 = tpu.matmul %7, %8, %cst {dimension_numbers = #tpu.dot_dimension_numbers<[1], [0], [0], [1], [0, 0, 1, 1], [], []>} : vector<128x128xbf16>, vector<128x32xbf16>, vector<128x32xf32> -> vector<128x32xf32>
    %10 = vector.broadcast %2 : vector<1x32xf32> to vector<128x32xf32>
    %11 = arith.addf %9, %10 : vector<128x32xf32>
    %12 = vector.broadcast %3 : vector<1x32xf32> to vector<128x32xf32>
    %13 = arith.mulf %11, %12 : vector<128x32xf32>
    %14 = vector.broadcast %4 : vector<1x32xf32> to vector<128x32xf32>
    %15 = arith.addf %13, %14 : vector<128x32xf32>
    %16 = vector.extract_strided_slice %1 {offsets = [0, 0], sizes = [1, 1], strides = [1, 1]} : vector<1x3xf32> to vector<1x1xf32>
    %cst_15 = arith.constant 0.000000e+00 : f32
    %17 = vector.broadcast %cst_15 : f32 to vector<128x32xf32>
    %18 = arith.cmpf oge, %15, %17 : vector<128x32xf32>
    %19 = vector.broadcast %16 : vector<1x1xf32> to vector<128x32xf32>
    %20 = arith.mulf %19, %15 : vector<128x32xf32>
    %21 = arith.select %18, %15, %20 : vector<128x32xi1>, vector<128x32xf32>
    %22 = arith.truncf %21 : vector<128x32xf32> to vector<128x32xbf16>
    %c0_16 = arith.constant 0 : index
    %c0_17 = arith.constant 0 : index
    %23 = vector.load %arg8[%c0_16, %c0_17] : memref<32x32xbf16, #tpu.memory_space<vmem>>, vector<32x32xbf16>
    %cst_18 = arith.constant dense<0.000000e+00> : vector<128x32xf32>
    %24 = tpu.matmul %22, %23, %cst_18 {dimension_numbers = #tpu.dot_dimension_numbers<[1], [0], [0], [1], [0, 0, 1, 1], [], []>} : vector<128x32xbf16>, vector<32x32xbf16>, vector<128x32xf32> -> vector<128x32xf32>
    %25 = vector.broadcast %5 : vector<1x32xf32> to vector<128x32xf32>
    %26 = arith.addf %24, %25 : vector<128x32xf32>
    %cst_19 = arith.constant 0.000000e+00 : f32
    %27 = vector.broadcast %cst_19 : f32 to vector<128x32xf32>
    %28 = arith.cmpf oge, %26, %27 : vector<128x32xf32>
    %29 = vector.broadcast %0 : vector<1x1xf32> to vector<128x32xf32>
    %30 = arith.mulf %29, %26 : vector<128x32xf32>
    %31 = arith.select %28, %26, %30 : vector<128x32xi1>, vector<128x32xf32>
    %32 = arith.truncf %31 : vector<128x32xf32> to vector<128x32xbf16>
    %c0_20 = arith.constant 0 : index
    %c0_21 = arith.constant 0 : index
    %33 = vector.load %arg10[%c0_20, %c0_21] : memref<32x32xbf16, #tpu.memory_space<vmem>>, vector<32x32xbf16>
    %cst_22 = arith.constant dense<0.000000e+00> : vector<128x32xf32>
    %34 = tpu.matmul %32, %33, %cst_22 {dimension_numbers = #tpu.dot_dimension_numbers<[1], [0], [0], [1], [0, 0, 1, 1], [], []>} : vector<128x32xbf16>, vector<32x32xbf16>, vector<128x32xf32> -> vector<128x32xf32>
    %c0_23 = arith.constant 0 : index
    %c0_24 = arith.constant 0 : index
    %35 = vector.load %arg12[%c0_23, %c0_24] : memref<1x32xf32, #tpu.memory_space<vmem>>, vector<1x32xf32>
    %c0_25 = arith.constant 0 : index
    %c0_26 = arith.constant 0 : index
    %36 = vector.load %arg13[%c0_25, %c0_26] : memref<1x32xf32, #tpu.memory_space<vmem>>, vector<1x32xf32>
    %c0_27 = arith.constant 0 : index
    %c0_28 = arith.constant 0 : index
    %37 = vector.load %arg14[%c0_27, %c0_28] : memref<1x32xf32, #tpu.memory_space<vmem>>, vector<1x32xf32>
    %c0_29 = arith.constant 0 : index
    %c0_30 = arith.constant 0 : index
    %38 = vector.load %arg16[%c0_29, %c0_30] : memref<1x32xf32, #tpu.memory_space<vmem>>, vector<1x32xf32>
    %c0_31 = arith.constant 0 : index
    %c0_32 = arith.constant 0 : index
    %39 = vector.load %arg2[%c0_31, %c0_32] : memref<128x128xf32, #tpu.memory_space<vmem>>, vector<128x128xf32>
    %40 = arith.truncf %39 : vector<128x128xf32> to vector<128x128xbf16>
    %c0_33 = arith.constant 0 : index
    %c0_34 = arith.constant 0 : index
    %41 = vector.load %arg11[%c0_33, %c0_34] : memref<128x32xbf16, #tpu.memory_space<vmem>>, vector<128x32xbf16>
    %cst_35 = arith.constant dense<0.000000e+00> : vector<128x32xf32>
    %42 = tpu.matmul %40, %41, %cst_35 {dimension_numbers = #tpu.dot_dimension_numbers<[1], [0], [0], [1], [0, 0, 1, 1], [], []>} : vector<128x128xbf16>, vector<128x32xbf16>, vector<128x32xf32> -> vector<128x32xf32>
    %43 = vector.broadcast %35 : vector<1x32xf32> to vector<128x32xf32>
    %44 = arith.addf %42, %43 : vector<128x32xf32>
    %45 = vector.broadcast %36 : vector<1x32xf32> to vector<128x32xf32>
    %46 = arith.mulf %44, %45 : vector<128x32xf32>
    %47 = vector.broadcast %37 : vector<1x32xf32> to vector<128x32xf32>
    %48 = arith.addf %46, %47 : vector<128x32xf32>
    %49 = vector.extract_strided_slice %1 {offsets = [0, 1], sizes = [1, 1], strides = [1, 1]} : vector<1x3xf32> to vector<1x1xf32>
    %cst_36 = arith.constant 0.000000e+00 : f32
    %50 = vector.broadcast %cst_36 : f32 to vector<128x32xf32>
    %51 = arith.cmpf oge, %48, %50 : vector<128x32xf32>
    %52 = vector.broadcast %49 : vector<1x1xf32> to vector<128x32xf32>
    %53 = arith.mulf %52, %48 : vector<128x32xf32>
    %54 = arith.select %51, %48, %53 : vector<128x32xi1>, vector<128x32xf32>
    %55 = arith.truncf %54 : vector<128x32xf32> to vector<128x32xbf16>
    %c0_37 = arith.constant 0 : index
    %c0_38 = arith.constant 0 : index
    %56 = vector.load %arg15[%c0_37, %c0_38] : memref<32x32xbf16, #tpu.memory_space<vmem>>, vector<32x32xbf16>
    %cst_39 = arith.constant dense<0.000000e+00> : vector<128x32xf32>
    %57 = tpu.matmul %55, %56, %cst_39 {dimension_numbers = #tpu.dot_dimension_numbers<[1], [0], [0], [1], [0, 0, 1, 1], [], []>} : vector<128x32xbf16>, vector<32x32xbf16>, vector<128x32xf32> -> vector<128x32xf32>
    %58 = vector.broadcast %38 : vector<1x32xf32> to vector<128x32xf32>
    %59 = arith.addf %57, %58 : vector<128x32xf32>
    %cst_40 = arith.constant 0.000000e+00 : f32
    %60 = vector.broadcast %cst_40 : f32 to vector<128x32xf32>
    %61 = arith.cmpf oge, %59, %60 : vector<128x32xf32>
    %62 = vector.broadcast %0 : vector<1x1xf32> to vector<128x32xf32>
    %63 = arith.mulf %62, %59 : vector<128x32xf32>
    %64 = arith.select %61, %59, %63 : vector<128x32xi1>, vector<128x32xf32>
    %65 = arith.truncf %64 : vector<128x32xf32> to vector<128x32xbf16>
    %c0_41 = arith.constant 0 : index
    %c0_42 = arith.constant 0 : index
    %66 = vector.load %arg17[%c0_41, %c0_42] : memref<32x32xbf16, #tpu.memory_space<vmem>>, vector<32x32xbf16>
    %cst_43 = arith.constant dense<0.000000e+00> : vector<128x32xf32>
    %67 = tpu.matmul %65, %66, %cst_43 {dimension_numbers = #tpu.dot_dimension_numbers<[1], [0], [0], [1], [0, 0, 1, 1], [], []>} : vector<128x32xbf16>, vector<32x32xbf16>, vector<128x32xf32> -> vector<128x32xf32>
    %68 = arith.addf %34, %67 : vector<128x32xf32>
    %c0_44 = arith.constant 0 : index
    %c0_45 = arith.constant 0 : index
    %69 = vector.load %arg19[%c0_44, %c0_45] : memref<1x32xf32, #tpu.memory_space<vmem>>, vector<1x32xf32>
    %c0_46 = arith.constant 0 : index
    %c0_47 = arith.constant 0 : index
    %70 = vector.load %arg20[%c0_46, %c0_47] : memref<1x32xf32, #tpu.memory_space<vmem>>, vector<1x32xf32>
    %c0_48 = arith.constant 0 : index
    %c0_49 = arith.constant 0 : index
    %71 = vector.load %arg21[%c0_48, %c0_49] : memref<1x32xf32, #tpu.memory_space<vmem>>, vector<1x32xf32>
    %c0_50 = arith.constant 0 : index
    %c0_51 = arith.constant 0 : index
    %72 = vector.load %arg23[%c0_50, %c0_51] : memref<1x32xf32, #tpu.memory_space<vmem>>, vector<1x32xf32>
    %c0_52 = arith.constant 0 : index
    %c0_53 = arith.constant 0 : index
    %73 = vector.load %arg3[%c0_52, %c0_53] : memref<128x128xf32, #tpu.memory_space<vmem>>, vector<128x128xf32>
    %74 = arith.truncf %73 : vector<128x128xf32> to vector<128x128xbf16>
    %c0_54 = arith.constant 0 : index
    %c0_55 = arith.constant 0 : index
    %75 = vector.load %arg18[%c0_54, %c0_55] : memref<128x32xbf16, #tpu.memory_space<vmem>>, vector<128x32xbf16>
    %cst_56 = arith.constant dense<0.000000e+00> : vector<128x32xf32>
    %76 = tpu.matmul %74, %75, %cst_56 {dimension_numbers = #tpu.dot_dimension_numbers<[1], [0], [0], [1], [0, 0, 1, 1], [], []>} : vector<128x128xbf16>, vector<128x32xbf16>, vector<128x32xf32> -> vector<128x32xf32>
    %77 = vector.broadcast %69 : vector<1x32xf32> to vector<128x32xf32>
    %78 = arith.addf %76, %77 : vector<128x32xf32>
    %79 = vector.broadcast %70 : vector<1x32xf32> to vector<128x32xf32>
    %80 = arith.mulf %78, %79 : vector<128x32xf32>
    %81 = vector.broadcast %71 : vector<1x32xf32> to vector<128x32xf32>
    %82 = arith.addf %80, %81 : vector<128x32xf32>
    %83 = vector.extract_strided_slice %1 {offsets = [0, 2], sizes = [1, 1], strides = [1, 1]} : vector<1x3xf32> to vector<1x1xf32>
    %cst_57 = arith.constant 0.000000e+00 : f32
    %84 = vector.broadcast %cst_57 : f32 to vector<128x32xf32>
    %85 = arith.cmpf oge, %82, %84 : vector<128x32xf32>
    %86 = vector.broadcast %83 : vector<1x1xf32> to vector<128x32xf32>
    %87 = arith.mulf %86, %82 : vector<128x32xf32>
    %88 = arith.select %85, %82, %87 : vector<128x32xi1>, vector<128x32xf32>
    %89 = arith.truncf %88 : vector<128x32xf32> to vector<128x32xbf16>
    %c0_58 = arith.constant 0 : index
    %c0_59 = arith.constant 0 : index
    %90 = vector.load %arg22[%c0_58, %c0_59] : memref<32x32xbf16, #tpu.memory_space<vmem>>, vector<32x32xbf16>
    %cst_60 = arith.constant dense<0.000000e+00> : vector<128x32xf32>
    %91 = tpu.matmul %89, %90, %cst_60 {dimension_numbers = #tpu.dot_dimension_numbers<[1], [0], [0], [1], [0, 0, 1, 1], [], []>} : vector<128x32xbf16>, vector<32x32xbf16>, vector<128x32xf32> -> vector<128x32xf32>
    %92 = vector.broadcast %72 : vector<1x32xf32> to vector<128x32xf32>
    %93 = arith.addf %91, %92 : vector<128x32xf32>
    %cst_61 = arith.constant 0.000000e+00 : f32
    %94 = vector.broadcast %cst_61 : f32 to vector<128x32xf32>
    %95 = arith.cmpf oge, %93, %94 : vector<128x32xf32>
    %96 = vector.broadcast %0 : vector<1x1xf32> to vector<128x32xf32>
    %97 = arith.mulf %96, %93 : vector<128x32xf32>
    %98 = arith.select %95, %93, %97 : vector<128x32xi1>, vector<128x32xf32>
    %99 = arith.truncf %98 : vector<128x32xf32> to vector<128x32xbf16>
    %c0_62 = arith.constant 0 : index
    %c0_63 = arith.constant 0 : index
    %100 = vector.load %arg24[%c0_62, %c0_63] : memref<32x32xbf16, #tpu.memory_space<vmem>>, vector<32x32xbf16>
    %cst_64 = arith.constant dense<0.000000e+00> : vector<128x32xf32>
    %101 = tpu.matmul %99, %100, %cst_64 {dimension_numbers = #tpu.dot_dimension_numbers<[1], [0], [0], [1], [0, 0, 1, 1], [], []>} : vector<128x32xbf16>, vector<32x32xbf16>, vector<128x32xf32> -> vector<128x32xf32>
    %102 = arith.addf %68, %101 : vector<128x32xf32>
    %c0_65 = arith.constant 0 : index
    %c0_66 = arith.constant 0 : index
    %103 = vector.load %arg27[%c0_65, %c0_66] : memref<128x32xf32, #tpu.memory_space<vmem>>, vector<128x32xf32>
    tpu.vector_store %arg27[%c0_65, %c0_66], %102 {strides = array<i32>} : memref<128x32xf32, #tpu.memory_space<vmem>>, vector<128x32xf32>,
    return
  }
  func.func @transform_0(%arg0: i32) -> (i32, i32) {
    %c0_i32 = arith.constant 0 : i32
    %c0_i32_0 = arith.constant 0 : i32
    return %arg0, %c0_i32 : i32, i32
  }
  func.func @transform_1(%arg0: i32) -> (i32, i32) {
    %c0_i32 = arith.constant 0 : i32
    %c0_i32_0 = arith.constant 0 : i32
    return %arg0, %c0_i32 : i32, i32
  }
  func.func @transform_2(%arg0: i32) -> (i32, i32) {
    %c0_i32 = arith.constant 0 : i32
    %c0_i32_0 = arith.constant 0 : i32
    return %arg0, %c0_i32 : i32, i32
  }
  func.func @transform_3(%arg0: i32) -> (i32, i32) {
    %c0_i32 = arith.constant 0 : i32
    %c0_i32_0 = arith.constant 0 : i32
    %c0_i32_1 = arith.constant 0 : i32
    return %c0_i32, %c0_i32_0 : i32, i32
  }
  func.func @transform_4(%arg0: i32) -> (i32, i32) {
    %c0_i32 = arith.constant 0 : i32
    %c0_i32_0 = arith.constant 0 : i32
    %c0_i32_1 = arith.constant 0 : i32
    return %c0_i32, %c0_i32_0 : i32, i32
  }
  func.func @transform_5(%arg0: i32) -> (i32, i32) {
    %c0_i32 = arith.constant 0 : i32
    %c0_i32_0 = arith.constant 0 : i32
    %c0_i32_1 = arith.constant 0 : i32
    return %c0_i32, %c0_i32_0 : i32, i32
  }
  func.func @transform_6(%arg0: i32) -> (i32, i32) {
    %c0_i32 = arith.constant 0 : i32
    %c0_i32_0 = arith.constant 0 : i32
    %c0_i32_1 = arith.constant 0 : i32
    return %c0_i32, %c0_i32_0 : i32, i32
  }
  func.func @transform_7(%arg0: i32) -> (i32, i32) {
    %c0_i32 = arith.constant 0 : i32
    %c0_i32_0 = arith.constant 0 : i32
    %c0_i32_1 = arith.constant 0 : i32
    return %c0_i32, %c0_i32_0 : i32, i32
  }
  func.func @transform_8(%arg0: i32) -> (i32, i32) {
    %c0_i32 = arith.constant 0 : i32
    %c0_i32_0 = arith.constant 0 : i32
    %c0_i32_1 = arith.constant 0 : i32
    return %c0_i32, %c0_i32_0 : i32, i32
  }
  func.func @transform_9(%arg0: i32) -> (i32, i32) {
    %c0_i32 = arith.constant 0 : i32
    %c0_i32_0 = arith.constant 0 : i32
    %c0_i32_1 = arith.constant 0 : i32
    return %c0_i32, %c0_i32_0 : i32, i32
  }
  func.func @transform_10(%arg0: i32) -> (i32, i32) {
    %c0_i32 = arith.constant 0 : i32
    %c0_i32_0 = arith.constant 0 : i32
    %c0_i32_1 = arith.constant 0 : i32
    return %c0_i32, %c0_i32_0 : i32, i32
  }
  func.func @transform_11(%arg0: i32) -> (i32, i32) {
    %c0_i32 = arith.constant 0 : i32
    %c0_i32_0 = arith.constant 0 : i32
    %c0_i32_1 = arith.constant 0 : i32
    return %c0_i32, %c0_i32_0 : i32, i32
  }
  func.func @transform_12(%arg0: i32) -> (i32, i32) {
    %c0_i32 = arith.constant 0 : i32
    %c0_i32_0 = arith.constant 0 : i32
    %c0_i32_1 = arith.constant 0 : i32
    return %c0_i32, %c0_i32_0 : i32, i32
  }
  func.func @transform_13(%arg0: i32) -> (i32, i32) {
    %c0_i32 = arith.constant 0 : i32
    %c0_i32_0 = arith.constant 0 : i32
    %c0_i32_1 = arith.constant 0 : i32
    return %c0_i32, %c0_i32_0 : i32, i32
  }
  func.func @transform_14(%arg0: i32) -> (i32, i32) {
    %c0_i32 = arith.constant 0 : i32
    %c0_i32_0 = arith.constant 0 : i32
    %c0_i32_1 = arith.constant 0 : i32
    return %c0_i32, %c0_i32_0 : i32, i32
  }
  func.func @transform_15(%arg0: i32) -> (i32, i32) {
    %c0_i32 = arith.constant 0 : i32
    %c0_i32_0 = arith.constant 0 : i32
    %c0_i32_1 = arith.constant 0 : i32
    return %c0_i32, %c0_i32_0 : i32, i32
  }
  func.func @transform_16(%arg0: i32) -> (i32, i32) {
    %c0_i32 = arith.constant 0 : i32
    %c0_i32_0 = arith.constant 0 : i32
    %c0_i32_1 = arith.constant 0 : i32
    return %c0_i32, %c0_i32_0 : i32, i32
  }
  func.func @transform_17(%arg0: i32) -> (i32, i32) {
    %c0_i32 = arith.constant 0 : i32
    %c0_i32_0 = arith.constant 0 : i32
    %c0_i32_1 = arith.constant 0 : i32
    return %c0_i32, %c0_i32_0 : i32, i32
  }
  func.func @transform_18(%arg0: i32) -> (i32, i32) {
    %c0_i32 = arith.constant 0 : i32
    %c0_i32_0 = arith.constant 0 : i32
    %c0_i32_1 = arith.constant 0 : i32
    return %c0_i32, %c0_i32_0 : i32, i32
  }
  func.func @transform_19(%arg0: i32) -> (i32, i32) {
    %c0_i32 = arith.constant 0 : i32
    %c0_i32_0 = arith.constant 0 : i32
    %c0_i32_1 = arith.constant 0 : i32
    return %c0_i32, %c0_i32_0 : i32, i32
  }
  func.func @transform_20(%arg0: i32) -> (i32, i32) {
    %c0_i32 = arith.constant 0 : i32
    %c0_i32_0 = arith.constant 0 : i32
    %c0_i32_1 = arith.constant 0 : i32
    return %c0_i32, %c0_i32_0 : i32, i32
  }
  func.func @transform_21(%arg0: i32) -> (i32, i32) {
    %c0_i32 = arith.constant 0 : i32
    %c0_i32_0 = arith.constant 0 : i32
    %c0_i32_1 = arith.constant 0 : i32
    return %c0_i32, %c0_i32_0 : i32, i32
  }
  func.func @transform_22(%arg0: i32) -> (i32, i32) {
    %c0_i32 = arith.constant 0 : i32
    %c0_i32_0 = arith.constant 0 : i32
    %c0_i32_1 = arith.constant 0 : i32
    return %c0_i32, %c0_i32_0 : i32, i32
  }
  func.func @transform_23(%arg0: i32) -> (i32, i32) {
    %c0_i32 = arith.constant 0 : i32
    %c0_i32_0 = arith.constant 0 : i32
    %c0_i32_1 = arith.constant 0 : i32
    return %c0_i32, %c0_i32_0 : i32, i32
  }
  func.func @transform_24(%arg0: i32) -> (i32, i32) {
    %c0_i32 = arith.constant 0 : i32
    %c0_i32_0 = arith.constant 0 : i32
    %c0_i32_1 = arith.constant 0 : i32
    return %c0_i32, %c0_i32_0 : i32, i32
  }
  func.func @transform_25(%arg0: i32) -> (i32, i32) {
    %c0_i32 = arith.constant 0 : i32
    %c0_i32_0 = arith.constant 0 : i32
    %c0_i32_1 = arith.constant 0 : i32
    return %c0_i32, %c0_i32_0 : i32, i32
  }
  func.func @transform_26(%arg0: i32) -> (i32, i32) {
    %c0_i32 = arith.constant 0 : i32
    %c0_i32_0 = arith.constant 0 : i32
    return %arg0, %c0_i32 : i32, i32
  }
}

</mosaic_0001>

<bundles_post_ra>
// kernel: tpu_custom_call.1
= control target key start
LH: loop header
LB: loop body
LE: loop exit
PB: predicated region body
PF: predicated region fallthrough
CT: control target
= control target key end

     0   :  { %s3946_s0 = inlined_call_operand.hbm [shape: f32[256,128], index: 0, kind: input, shape index: {}]   ;;  %s3947_s1 = inlined_call_operand.hbm [shape: f32[256,128], index: 1, kind: input, shape index: {}]   ;;  %s3948_s2 = inlined_call_operand.hbm [shape: f32[256,128], index: 2, kind: input, shape index: {}]   ;;  %s3949_s3 = inlined_call_operand.vmem [shape: bf16[128,32], index: 3, kind: input, shape index: {}]   ;;  %s3950_s4 = inlined_call_operand.vmem [shape: f32[1,32], index: 4, kind: input, shape index: {}]   ;;  %s3951_s5 = inlined_call_operand.vmem [shape: f32[1,32], index: 5, kind: input, shape index: {}]   ;;  %s3952_s6 = inlined_call_operand.vmem [shape: f32[1,32], index: 6, kind: input, shape index: {}]   ;;  %s3953_s7 = inlined_call_operand.vmem [shape: bf16[32,32], index: 7, kind: input, shape index: {}]   ;;  %s3954_s8 = inlined_call_operand.vmem [shape: f32[1,32], index: 8, kind: input, shape index: {}]   ;;  %s3955_s9 = inlined_call_operand.vmem [shape: bf16[32,32], index: 9, kind: input, shape index: {}]   ;;  %s3956_s10 = inlined_call_operand.vmem [shape: bf16[128,32], index: 10, kind: input, shape index: {}]   ;;  %s3957_s11 = inlined_call_operand.vmem [shape: f32[1,32], index: 11, kind: input, shape index: {}]   ;;  %s3958_s12 = inlined_call_operand.vmem [shape: f32[1,32], index: 12, kind: input, shape index: {}]   ;;  %s3959_s13 = inlined_call_operand.vmem [shape: f32[1,32], index: 13, kind: input, shape index: {}]   ;;  %s3960_s14 = inlined_call_operand.vmem [shape: bf16[32,32], index: 14, kind: input, shape index: {}]   ;;  %s3961_s15 = inlined_call_operand.vmem [shape: f32[1,32], index: 15, kind: input, shape index: {}]   ;;  %s3962_s16 = inlined_call_operand.vmem [shape: bf16[32,32], index: 16, kind: input, shape index: {}]   ;;  %s3963_s17 = inlined_call_operand.vmem [shape: bf16[128,32], index: 17, kind: input, shape index: {}]   ;;  %s3964_s18 = inlined_call_operand.vmem [shape: f32[1,32], index: 18, kind: input, shape index: {}]   ;;  %s3965_s19 = inlined_call_operand.vmem [shape: f32[1,32], index: 19, kind: input, shape index: {}]   ;;  %s3966_s20 = inlined_call_operand.vmem [shape: f32[1,32], index: 20, kind: input, shape index: {}]   ;;  %s3967_s21 = inlined_call_operand.vmem [shape: bf16[32,32], index: 21, kind: input, shape index: {}]   ;;  %s3968_s22 = inlined_call_operand.vmem [shape: f32[1,32], index: 22, kind: input, shape index: {}]   ;;  %s3969_s23 = inlined_call_operand.vmem [shape: bf16[32,32], index: 23, kind: input, shape index: {}]   ;;  %s3970_s24 = inlined_call_operand.vmem [shape: f32[1,3], index: 24, kind: input, shape index: {}]   ;;  %s3971_s25 = inlined_call_operand.<no memory space> [shape: f32[1,1], index: 25, kind: input, shape index: {}]   ;;  %s3972_s26 = inlined_call_operand.vmem [shape: f32[256,32], index: 26, kind: output, shape index: {}]  }
   0x1   :  { %3988 = sst [smem:[#allocation13_spill]] %s3946_s0  ;;  %v31_v0 = vstv %s3971_s25 }
   0x2   :  { %3989 = sst [smem:[#allocation14_spill]] %s3947_s1  ;;  %32 = vst [vmem:[#allocation2] sm:$0x1] %v31_v0 }
   0x3   :  { %3990 = sst [smem:[#allocation15_spill]] %s3948_s2 }
   0x4   :  { %3991 = sst [smem:[#allocation16_spill]] %s3949_s3 }
   0x5   :  { %3992 = sst [smem:[#allocation17_spill]] %s3950_s4 }
   0x6   :  { %3993 = sst [smem:[#allocation18_spill]] %s3951_s5 }
   0x7   :  { %3994 = sst [smem:[#allocation19_spill]] %s3952_s6 }
   0x8   :  { %3995 = sst [smem:[#allocation20_spill]] %s3953_s7 }
   0x9   :  { %3996 = sst [smem:[#allocation21_spill]] %s3954_s8 }
   0xa   :  { %3997 = sst [smem:[#allocation22_spill]] %s3955_s9 }
   0xb   :  { %3998 = sst [smem:[#allocation23_spill]] %s3956_s10 }
   0xc   :  { %3999 = sst [smem:[#allocation24_spill]] %s3957_s11 }
   0xd   :  { %4000 = sst [smem:[#allocation25_spill]] %s3958_s12 }
   0xe   :  { %4001 = sst [smem:[#allocation26_spill]] %s3959_s13 }
   0xf   :  { %4002 = sst [smem:[#allocation27_spill]] %s3961_s15 }
  0x10   :  { %4003 = sst [smem:[#allocation28_spill]] %s3962_s16 }
  0x11   :  { %4004 = sst [smem:[#allocation29_spill]] %s3966_s20 }
  0x12   :  { %4005 = sst [smem:[#allocation30_spill]] %s3968_s22 }
  0x13   :  { %4006 = sst [smem:[#allocation31_spill]] %s3969_s23 }
  0x14   :  { %4007 = sst [smem:[#allocation32_spill]] %s3972_s26 }
  0x15   :  { %33 = vsyncpa [#allocation4], 0 }
  0x16   :  { %35 = vsyncpa [#allocation4 + $0x1], 0 }
  0x17   :  { %36 = vsyncpa [#allocation6], 0 }
  0x18   :  { %38 = vsyncpa [#allocation6 + $0x1], 0  ;;  %s3094_s7 = smov 0   ;;  %s3096_s28 = smov 0  }
  0x19   :  { %s3098_s8 = smov 0   ;;  %s3100_s4 = smov 0  }
  0x1a LB: > { %4008 = sst [smem:[#allocation10_spill]] %s2945_s8  ;;  %s3113_s25 = sadd.s32 4294967295, %s2949_s4   ;;  %s2949_s4 = sphi %s3100_s4, %s4037_s4   ;;  %s2945_s8 = sphi %s3098_s8, %s4039_s8   ;;  %s2941_s28 = sphi %s3096_s28, %s4041_s28   ;;  %s2937_s7 = sphi %s3094_s7, %s4040_s7  }
  0x1b   : > { %s3116_s29 = sadd.s32 1, %s2949_s4   ;;  %s51_s9 = sadd.s32 1, %s2945_s8 }
  0x1c   : > { %4009 = sst [smem:[#allocation11_spill]] %s3116_s29  ;;  %s48_s0 = ssub.s32 %s2949_s4, %s3116_s29 }
  0x1d   : > { %p49_p0 = scmp.eq.s32.totalorder %s48_s0, 0  ;;  %p58_p1 = scmp.ne.s32.totalorder %s2945_s8, %s2941_s28 }
  0x1e   : > { %p59_p2 = scmp.eq.s32.totalorder %s2949_s4, 0  ;;  %p64_p3 = scmp.ne.s32.totalorder %s2941_s28, %s2937_s7 }
  0x1f   : > { %s3126_s30 = scalar_select %p49_p0, %s2945_s8, %s51_s9  }
  0x20   : > { %p60_p4 = por %p59_p2, %p58_p1  ;;  %p65_p5 = scmp.eq.s32.totalorder %s3113_s25, 0 }
  0x21   : > { %4010 = sst [smem:[#allocation12_spill]] %s3126_s30  ;;  %p2764_p6 = scmp.lt.s32.totalorder %s2949_s4, 2 }
  0x22   : > { %p3130_p7 = por %p65_p5, %p64_p3  ;;  %s3982_s5 = sand.u32 1, %s2945_s8  }
  0x23   : > { %s3137_s10 = sshll.u32 %s3982_s5, 7  ;;  %s3140_s6 = sshll.u32 %s2949_s4, 7 }
  0x24   : > { %p3142_p8 = pnand %p2764_p6, %p60_p4  ;;  %s740_s27 = sand.u32 1, %s2949_s4  }
  0x25   : > { %s4013_s0 = sld [smem:[#allocation14_spill]]  ;;  %s744_s29 = scalar_lea.vmem [#allocation5], %s3137_s10 }
  0x26   : > { %s752_s26 = sshll.u32 %s744_s29, 4  ;;  %s3152_s5 = scalar_lea.sflag [#allocation6], %s740_s27  ;;  %s753_s26 = int_to_ptr.vmem [resolvable:$true] %s752_s26 }
  0x27   : > { %p2825_p10 = pneg %p3142_p8 }
  0x2b   : > { %s749_s9 = scalar_lea.hbm %s4013_s0, %s3140_s6  ;;  %s2828_s7 = scalar_lea.hbm %s4013_s0, 256 }
  0x2c   : > { %s750_s30 = sshll.u32 %s749_s9, 4  ;;  %s751_s30 = int_to_ptr.hbm [resolvable:$true] %s750_s30 }
  0x2d   : > { %s2821_s22 = sshra.s32 %s751_s30, 4  ;;  %s2822_s22 = int_to_ptr.hbm [resolvable:$true] %s2821_s22 }
  0x2e   : > { %s2823_s15 = scalar_lea.hbm %s2822_s22, 128  ;;  %p2829_p13 = scmp.lt.s32.totalorder %s2822_s22, %s4013_s0 }
  0x2f   : > { %p2824_p9 = scmp.ne.s32.totalorder %s2822_s22, %s2823_s15  ;;  %p2830_p0 = scmp.lt.s32.totalorder %s2828_s7, %s2823_s15 }
  0x31   : > { %p2826_p11 = pnand %p2825_p10, %p2824_p9  ;;  %p2831_p1 = por %p2830_p0, %p2829_p13 }
  0x33   : > { %p2827_p12 = pneg %p2826_p11 }
  0x35   : > { %p2832_p2 = pnand %p2831_p1, %p2827_p12 }
  0x37   : > { %2835 = shalt.err (!%p2832_p2)
}
  0x38   : > { %s2951_s27 = smov 128   ;;  %s2952_s16 = smov 8  }
  0x39   : > { %2760 = dma.hbm_to_vmem [thread:$0]  (!%p3142_p8), %s751_s30, 2048, %s753_s26, %s3152_s5, %s2951_s27, %s2951_s27, %s2952_s16  }
  0x3a   : > { %p2505_p3 = scmp.ge.s32.totalorder %s2949_s4, 1  ;;  %p782_p4 = scmp.lt.s32.totalorder %s2949_s4, 3 }
  0x3b   : > { %s4015_s3 = sld [smem:[#allocation13_spill]]  ;;  %s722_s29 = scalar_lea.vmem [#allocation3], %s3137_s10 }
  0x3c   : > { %p3173_p5 = pnand %p2505_p3, %p782_p4  ;;  %s730_s0 = sshll.u32 %s722_s29, 4  ;;  %s731_s0 = int_to_ptr.vmem [resolvable:$true] %s730_s0 }
  0x3d   : > { %s4016_s13 = sand.u32 1, %s2945_s8  }
  0x3e   : > { %s719_s12 = scalar_lea.sflag [#allocation4], %s4016_s13 }
  0x41   : > { %s727_s7 = scalar_lea.hbm %s4015_s3, %s3140_s6  ;;  %s2858_s22 = scalar_lea.hbm %s4015_s3, 256 }
  0x42   : > { %s728_s9 = sshll.u32 %s727_s7, 4  ;;  %s729_s9 = int_to_ptr.hbm [resolvable:$true] %s728_s9 }
  0x43   : > { %s2851_s11 = sshra.s32 %s729_s9, 4  ;;  %s2852_s11 = int_to_ptr.hbm [resolvable:$true] %s2851_s11 }
  0x44   : > { %s2853_s26 = scalar_lea.hbm %s2852_s11, 128  ;;  %p2859_p12 = scmp.lt.s32.totalorder %s2852_s11, %s4015_s3 }
  0x45   : > { %p2854_p6 = scmp.ne.s32.totalorder %s2852_s11, %s2853_s26  ;;  %p2860_p13 = scmp.lt.s32.totalorder %s2858_s22, %s2853_s26 }
  0x47   : > { %p2856_p9 = pnand %p2854_p6, %p2825_p10  ;;  %p2861_p0 = por %p2860_p13, %p2859_p12 }
  0x49   : > { %p2857_p11 = pneg %p2856_p9 }
  0x4b   : > { %p2862_p1 = pnand %p2861_p0, %p2857_p11 }
  0x4d   : > { %2865 = shalt.err (!%p2862_p1)
}
  0x4e   : > { %2757 = dma.hbm_to_vmem [thread:$0]  (!%p3142_p8), %s729_s9, 2048, %s731_s0, %s719_s12, %s2951_s27, %s2951_s27, %s2952_s16  }
  0x4f   : > { %s4017_s4 = sld [smem:[#allocation15_spill]]  ;;  %s766_s23 = scalar_lea.vmem [#allocation7], %s3137_s10 }
  0x50   : > { %s774_s11 = sshll.u32 %s766_s23, 4  ;;  %s775_s11 = int_to_ptr.vmem [resolvable:$true] %s774_s11 }
  0x55   : > { %s4018_s30 = smov %s4017_s4  ;;  %s771_s8 = scalar_lea.hbm %s4017_s4, %s3140_s6 }
  0x56   : > { %s772_s20 = sshll.u32 %s771_s8, 4  ;;  %s2888_s12 = scalar_lea.hbm %s4018_s30, 256  ;;  %s773_s20 = int_to_ptr.hbm [resolvable:$true] %s772_s20 }
  0x57   : > { %s2881_s26 = sshra.s32 %s773_s20, 4  ;;  %s2882_s26 = int_to_ptr.hbm [resolvable:$true] %s2881_s26 }
  0x58   : > { %s2883_s22 = scalar_lea.hbm %s2882_s26, 128  ;;  %p2889_p6 = scmp.lt.s32.totalorder %s2882_s26, %s4018_s30 }
  0x59   : > { %p2884_p2 = scmp.ne.s32.totalorder %s2882_s26, %s2883_s22  ;;  %p2890_p9 = scmp.lt.s32.totalorder %s2888_s12, %s2883_s22 }
  0x5b   : > { %p2886_p3 = pnand %p2884_p2, %p2825_p10  ;;  %p2891_p11 = por %p2890_p9, %p2889_p6 }
  0x5d   : > { %p2887_p4 = pneg %p2886_p3 }
  0x5f   : > { %p2892_p12 = pnand %p2891_p11, %p2887_p4 }
  0x61   : > { %2895 = shalt.err (!%p2892_p12)
}
  0x62   : > { %2763 = dma.hbm_to_vmem [thread:$0]  (!%p3142_p8), %s773_s20, 2048, %s775_s11, %s3152_s5, %s2951_s27, %s2951_s27, %s2952_s16  }
  0x63   : > { %786 = sbr.rel (%p3173_p5) target bundleno = 1046 (0x416), region = 124  ;;  %s788_s8 = sand.u32 (!%p3173_p5), 1, %s2941_s28  }
  0x64   : > { %s3221_s10 = sshll.u32 (!%p3173_p5), %s788_s8, 7  ;;  %s789_s6 = scalar_lea.sflag (!%p3173_p5), [#allocation4], %s788_s8 }
  0x65   : > { %s3224_s3 = scalar_lea.vmem (!%p3173_p5), [#allocation3], %s3221_s10 }
  0x68   : > { %2928 = dma.done.wait (%p3130_p7), %s789_s6, 2048  }
  0x69   : > { %2930 = vsyncadd (%p3130_p7), %s789_s6, 4294965248  ;;  %s798_s16 = sand.u32 1, %s3113_s25   ;;  %s3232_s5 = scalar_lea.vmem [#allocation5], %s3221_s10 }
  0x6a   : > { %s799_s20 = scalar_lea.sflag [#allocation6], %s798_s16 }
  0x6b   : > { %2932 = dma.done.wait (%p3130_p7), %s799_s20, 4096  }
  0x6c   : > { %2934 = vsyncadd (%p3130_p7), %s799_s20, 4294963200  ;;  %s4019_s15 = sld [smem:[#allocation16_spill]]  ;;  %v2953_v3 = vmov 0   ;;  %v3256_v7 = vld [vmem:[%s3970_s24] ss:$0 sm:$0xff]  ;;  %v908_v11 = vld [vmem:[%s3224_s3] sm:$0xff] }
  0x6d   : > { %2802 = vset.pattern.permute.xlu0 %v2953_v3  ;;  %v909_v12 = vld [vmem:[%s3224_s3 + $0x8] sm:$0xff]  ;;  %v910_v14 = vld [vmem:[%s3224_s3 + $0x10] sm:$0xff]  ;;  %v911_v15 = vld [vmem:[%s3224_s3 + $0x18] sm:$0xff]  ;;  %s4020_s13 = sld [smem:[#allocation20_spill]]  ;;  %v2954_v37 = vmov 2   ;;  %vm1167_vm2 = vcmask 261120  }
  0x6e   : > { %1105 = vperm.xlu0 %2802, %v3256_v7   ;;  %v924_v13 = vpack.c.bf16 %v909_v12, %v908_v11  ;;  %v925_v16 = vpack.c.bf16 %v911_v15, %v910_v14  ;;  %v912_v17 = vld [vmem:[%s3224_s3 + $0x20] sm:$0xff]  ;;  %v913_v18 = vld [vmem:[%s3224_s3 + $0x28] sm:$0xff]  ;;  %v914_v20 = vld [vmem:[%s3224_s3 + $0x30] sm:$0xff]  ;;  %2804 = vset.pattern.permute.xlu1 %v2954_v37  ;;  %s4022_s22 = sld [smem:[#allocation18_spill]]  ;;  %s3372_s29 = scalar_lea.vmem [#allocation7], %s3221_s10 }
  0x6f   : > { %v926_v19 = vpack.c.bf16 %v913_v18, %v912_v17  ;;  %v915_v21 = vld [vmem:[%s3224_s3 + $0x38] sm:$0xff]  ;;  %v916_v23 = vld [vmem:[%s3224_s3 + $0x40] sm:$0xff]  ;;  %v917_v24 = vld [vmem:[%s3224_s3 + $0x48] sm:$0xff]  ;;  %2070 = vperm.xlu1 %2804, %v3256_v7   ;;  %s4023_s0 = sld [smem:[#allocation19_spill]] }
  0x70   : > { %v927_v22 = vpack.c.bf16 %v915_v21, %v914_v20  ;;  %v928_v25 = vpack.c.bf16 %v917_v24, %v916_v23  ;;  %v918_v26 = vld [vmem:[%s3224_s3 + $0x50] sm:$0xff]  ;;  %v919_v27 = vld [vmem:[%s3224_s3 + $0x58] sm:$0xff]  ;;  %v920_v29 = vld [vmem:[%s3224_s3 + $0x60] sm:$0xff]  ;;  %s4024_s11 = sld [smem:[#allocation23_spill]] }
  0x71   : > { %v929_v28 = vpack.c.bf16 %v919_v27, %v918_v26  ;;  %v921_v30 = vld [vmem:[%s3224_s3 + $0x68] sm:$0xff]  ;;  %v922_v33 = vld [vmem:[%s3224_s3 + $0x70] sm:$0xff]  ;;  %v923_v34 = vld [vmem:[%s3224_s3 + $0x78] sm:$0xff]  ;;  %s4021_s3 = sld [smem:[#allocation17_spill]] }
  0x72   : > { %v2715_v1 = vld [vmem:[%s4019_s15 + $0x38] sm:$0xff]  ;;  %v2714_v2 = vld [vmem:[%s4019_s15 + $0x30] sm:$0xff]  ;;  %v2713_v4 = vld [vmem:[%s4019_s15 + $0x28] sm:$0xff]  ;;  %v930_v31 = vpack.c.bf16 %v921_v30, %v920_v29  ;;  %v931_v35 = vpack.c.bf16 %v923_v34, %v922_v33  ;;  %s4025_s10 = sld [smem:[#allocation21_spill]] }
  0x73   : > { %999 = vmatpush.bf16.msra.mxu0 %v2715_v1  ;;  %v2712_v5 = vld [vmem:[%s4019_s15 + $0x20] sm:$0xff]  ;;  %v2711_v6 = vld [vmem:[%s4019_s15 + $0x18] sm:$0xff]  ;;  %v2710_v8 = vld [vmem:[%s4019_s15 + $0x10] sm:$0xff]  ;;  %s4026_s7 = sld [smem:[#allocation29_spill]] }
  0x74   : > { %v2709_v9 = vld [vmem:[%s4019_s15 + $0x8] sm:$0xff]  ;;  %v2708_v10 = vld [vmem:[%s4019_s15] sm:$0xff]  ;;  %v2739_v58 = vld [vmem:[%s3963_s17 + $0x38] sm:$0xff]  ;;  %s4028_s6 = sld [smem:[#allocation25_spill]] }
  0x75   : > { %v2717_v32 = vld [vmem:[%s4020_s13 + $0x8] sm:$0xff]  ;;  %v2716_v36 = vld [vmem:[%s4020_s13] sm:$0xff]  ;;  %v2738_v60 = vld [vmem:[%s3963_s17 + $0x30] sm:$0xff]  ;;  %s4029_s1 = sld [smem:[#allocation26_spill]] }
  0x76   : > { %1198 = vmatpush.bf16.msra.mxu1 %v2717_v32  ;;  %2744 = vmatpush.bf16.msra.mxu2 %v2717_v32  ;;  %v2811_v39 = vld [vmem:[#allocation2] ss:$0 sm:$0xff]  ;;  %v2737_v0 = vld [vmem:[%s3963_s17 + $0x28] sm:$0xff]  ;;  %v2735_v12 = vld [vmem:[%s3963_s17 + $0x18] sm:$0xff]  ;;  %s4030_s4 = sld [smem:[#allocation28_spill]] }
  0x77   : > { %1000 = vmatpush.bf16.msra.mxu0 %v2714_v2  ;;  %2745 = vmatpush.bf16.msra.mxu3 %v2717_v32  ;;  %v3295_v38 = vld [vmem:[%s4021_s3] ss:$0 sm:$0xff]  ;;  %v2734_v15 = vld [vmem:[%s3963_s17 + $0x10] sm:$0xff]  ;;  %v2733_v20 = vld [vmem:[%s3963_s17 + $0x8] sm:$0xff]  ;;  %s4032_s3 = sld [smem:[#allocation22_spill]] }
  0x78   : > { %2805 = vset.pattern.permute.xlu1 %v2953_v3  ;;  %v3301_v42 = vld [vmem:[%s4022_s22] ss:$0 sm:$0xff]  ;;  %v1875_v29 = vld [vmem:[%s3372_s29] sm:$0xff]  ;;  %v1876_v30 = vld [vmem:[%s3372_s29 + $0x8] sm:$0xff]  ;;  %s4033_s9 = sld [smem:[#allocation31_spill]] }
  0x79   : > { %1260 = vperm.xlu1 %2805, %v2811_v39   ;;  %v3307_v44 = vld [vmem:[%s4023_s0] ss:$0 sm:$0xff]  ;;  %v1891_v34 = vpack.c.bf16 %v1876_v30, %v1875_v29  ;;  %s4027_s0 = sld [smem:[#allocation24_spill]] }
  0x7a   : > { %1199 = vmatpush.bf16.msra.mxu1 %v2716_v36  ;;  %2746 = vmatpush.bf16.msra.mxu2 %v2716_v36  ;;  %v2724_v27 = vld [vmem:[%s4024_s11 + $0x20] sm:$0xff]  ;;  %s4034_s16 = sld [smem:[#allocation27_spill]] }
  0x7b   : > { %1001 = vmatpush.bf16.msra.mxu0 %v2713_v4  ;;  %2747 = vmatpush.bf16.msra.mxu3 %v2716_v36  ;;  %v2736_v4 = vld [vmem:[%s3963_s17 + $0x20] sm:$0xff]  ;;  %v2723_v36 = vld [vmem:[%s4024_s11 + $0x18] sm:$0xff] }
  0x7c   : > { %s4031_s23 = smov %s4030_s4 }
  0x7f   : > { %1002 = vmatpush.bf16.msra.mxu0 %v2712_v5 }
  0x83   : > { %1003 = vmatpush.bf16.msra.mxu0 %v2711_v6 }
  0x87   : > { %1004 = vmatpush.bf16.msra.mxu0 %v2710_v8 }
  0x8b   : > { %1005 = vmatpush.bf16.msra.mxu0 %v2709_v9 }
  0x8f   : > { %1006 = vmatpush.bf16.msra.mxu0 %v2708_v10 }
  0x92   : > { %1007 = vmatmul.bf16.vlgmr.msra.gmra.mxu0 %v924_v13  ;;  %v2727_v13 = vld [vmem:[%s4024_s11 + $0x38] sm:$0xff] }
  0x93   : > { %1966 = vmatpush.bf16.msrb.mxu0 %v2739_v58  ;;  %1402 = vmatpush.bf16.msrb.mxu2 %v2727_v13 }
  0x97   : > { %1967 = vmatpush.bf16.msrb.mxu0 %v2738_v60 }
  0x9b   : > { %1968 = vmatpush.bf16.msrb.mxu0 %v2737_v0 }
  0x9f   : > { %1969 = vmatpush.bf16.msrb.mxu0 %v2736_v4 }
  0xa2   : > { %1012 = vmatmul.bf16.gmra.mxu0 %v925_v16  ;;  %v2726_v16 = vld [vmem:[%s4024_s11 + $0x30] sm:$0xff] }
  0xa3   : > { %1970 = vmatpush.bf16.msrb.mxu0 %v2735_v12  ;;  %1403 = vmatpush.bf16.msrb.mxu2 %v2726_v16 }
  0xa7   : > { %1971 = vmatpush.bf16.msrb.mxu0 %v2734_v15 }
  0xab   : > { %1972 = vmatpush.bf16.msrb.mxu0 %v2733_v20 }
  0xb2   : > { %1017 = vmatmul.bf16.gmra.mxu0 %v926_v19 }
  0xc2   : > { %1022 = vmatmul.bf16.gmra.mxu0 %v927_v22  ;;  %v2725_v22 = vld [vmem:[%s4024_s11 + $0x28] sm:$0xff] }
  0xc3   : > { %1404 = vmatpush.bf16.msrb.mxu2 %v2725_v22  ;;  %v1311_v22 = vld [vmem:[%s3232_s5] sm:$0xff] }
  0xc7   : > { %1405 = vmatpush.bf16.msrb.mxu2 %v2724_v27 }
  0xcb   : > { %1406 = vmatpush.bf16.msrb.mxu2 %v2723_v36 }
  0xd2   : > { %1027 = vmatmul.bf16.gmra.mxu0 %v928_v25  ;;  %v2732_v25 = vld [vmem:[%s3963_s17] sm:$0xff] }
  0xd3   : > { %1973 = vmatpush.bf16.msrb.mxu0 %v2732_v25  ;;  %v1881_v25 = vld [vmem:[%s3372_s29 + $0x30] sm:$0xff] }
  0xe0   : > { %v3311_v48 = vpop.permute.xlu0 %1105 }
  0xe2   : > { %1032 = vmatmul.bf16.gmra.mxu0 %v929_v28 }
  0xf2   : > { %1037 = vmatmul.bf16.gmra.mxu0 %v930_v31 }
 0x102   : > { %1042 = vmatmul.bf16.gmra.mxu0 %v931_v35 }
 0x10f   : > { %v1008_v40 = vpop.f32.mrf.mxu0 }
 0x110   : > { %v1009_v41 = vadd.f32 %v3295_v38, %v1008_v40  ;;  %v2722_v40 = vld [vmem:[%s4024_s11 + $0x10] sm:$0xff] }
 0x111   : > { %1407 = vmatpush.bf16.msrb.mxu2 %v2722_v40 }
 0x112   : > { %v1051_v43 = vmul.f32 %v3301_v42, %v1009_v41  ;;  %1974 = vmatmul.bf16.vlgmr.msrb.gmra.mxu0 %v1891_v34 }
 0x114   : > { %v1070_v46 = vadd.f32 %v3307_v44, %v1051_v43 }
 0x116   : > { %v1108_v51 = vmul.f32 %v3311_v48, %v1070_v46  ;;  %vm1086_vm0 = vcmp.ge.f32.partialorder %v1070_v46, 0.0 }
 0x117   : > { %v1010_v45 = vpop.f32.mrf.mxu0 }
 0x118   : > { %v1011_v47 = vadd.f32 %v3295_v38, %v1010_v45  ;;  %v1124_v55 = vsel %vm1086_vm0, %v1070_v46, %v1108_v51 }
 0x11a   : > { %v1052_v49 = vmul.f32 %v3301_v42, %v1011_v47  ;;  %v2721_v47 = vld [vmem:[%s4024_s11 + $0x8] sm:$0xff] }
 0x11b   : > { %1408 = vmatpush.bf16.msrb.mxu2 %v2721_v47 }
 0x11c   : > { %v1071_v50 = vadd.f32 %v3307_v44, %v1052_v49 }
 0x11e   : > { %vm1087_vm1 = vcmp.ge.f32.partialorder %v1071_v50, 0.0  ;;  %v1109_v52 = vmul.f32 %v3311_v48, %v1071_v50 }
 0x11f   : > { %v1013_v53 = vpop.f32.mrf.mxu0 }
 0x120   : > { %v1014_v54 = vadd.f32 %v3295_v38, %v1013_v53  ;;  %v1125_v56 = vsel %vm1087_vm1, %v1071_v50, %v1109_v52  ;;  %v2720_v52 = vld [vmem:[%s4024_s11] sm:$0xff] }
 0x121   : > { %v1140_v57 = vpack.c.bf16 %v1125_v56, %v1124_v55  ;;  %v1878_v55 = vld [vmem:[%s3372_s29 + $0x18] sm:$0xff]  ;;  %1409 = vmatpush.bf16.msrb.mxu2 %v2720_v52 }
 0x122   : > { %v1053_v59 = vmul.f32 %v3301_v42, %v1014_v54  ;;  %v1877_v54 = vld [vmem:[%s3372_s29 + $0x10] sm:$0xff] }
 0x123   : > { %2551 = vmatmul.msk.bf16.vlgmr.msra.gmra.mxu1 %vm1167_vm2, %v1140_v57 }
 0x124   : > { %v1072_v62 = vadd.f32 %v3307_v44, %v1053_v59  ;;  %v1892_v59 = vpack.c.bf16 %v1878_v55, %v1877_v54 }
 0x126   : > { %v1110_v2 = vmul.f32 %v3311_v48, %v1072_v62  ;;  %vm1088_vm3 = vcmp.ge.f32.partialorder %v1072_v62, 0.0  ;;  %1979 = vmatmul.bf16.gmra.mxu0 %v1892_v59 }
 0x127   : > { %v1015_v61 = vpop.f32.mrf.mxu0 }
 0x128   : > { %v1016_v63 = vadd.f32 %v3295_v38, %v1015_v61  ;;  %v1126_v9 = vsel %vm1088_vm3, %v1072_v62, %v1110_v2 }
 0x12a   : > { %v1054_v1 = vmul.f32 %v3301_v42, %v1016_v63 }
 0x12c   : > { %v1073_v3 = vadd.f32 %v3307_v44, %v1054_v1 }
 0x12e   : > { %vm1089_vm4 = vcmp.ge.f32.partialorder %v1073_v3, 0.0  ;;  %v1111_v5 = vmul.f32 %v3311_v48, %v1073_v3 }
 0x12f   : > { %v1018_v6 = vpop.f32.mrf.mxu0 }
 0x130   : > { %v1019_v8 = vadd.f32 %v3295_v38, %v1018_v6  ;;  %v1127_v10 = vsel %vm1089_vm4, %v1073_v3, %v1111_v5  ;;  %v1879_v6 = vld [vmem:[%s3372_s29 + $0x20] sm:$0xff] }
 0x131   : > { %v1141_v11 = vpack.c.bf16 %v1127_v10, %v1126_v9 }
 0x132   : > { %v1055_v14 = vmul.f32 %v3301_v42, %v1019_v8  ;;  %v1880_v8 = vld [vmem:[%s3372_s29 + $0x28] sm:$0xff] }
 0x133   : > { %2552 = vmatmul.msk.bf16.gmra.mxu1 %vm1167_vm2, %v1141_v11  ;;  %v1893_v12 = vpack.c.bf16 %v1880_v8, %v1879_v6  ;;  %v1317_v6 = vld [vmem:[%s3232_s5 + $0x30] sm:$0xff]  ;;  %v1318_v8 = vld [vmem:[%s3232_s5 + $0x38] sm:$0xff] }
 0x134   : > { %v1074_v18 = vadd.f32 %v3307_v44, %v1055_v14 }
 0x136   : > { %v1112_v23 = vmul.f32 %v3311_v48, %v1074_v18  ;;  %vm1090_vm5 = vcmp.ge.f32.partialorder %v1074_v18, 0.0  ;;  %1984 = vmatmul.bf16.gmra.mxu0 %v1893_v12  ;;  %v1319_v12 = vld [vmem:[%s3232_s5 + $0x40] sm:$0xff] }
 0x137   : > { %v1020_v17 = vpop.f32.mrf.mxu0 }
 0x138   : > { %v1021_v19 = vadd.f32 %v3295_v38, %v1020_v17  ;;  %v1128_v32 = vsel %vm1090_vm5, %v1074_v18, %v1112_v23  ;;  %v2955_v18 = vmov 1   ;;  %v1312_v23 = vld [vmem:[%s3232_s5 + $0x8] sm:$0xff] }
 0x139   : > { %2803 = vset.pattern.permute.xlu0 %v2955_v18  ;;  %v2729_v18 = vld [vmem:[%s3960_s14 + $0x8] sm:$0xff] }
 0x13a   : > { %v1056_v21 = vmul.f32 %v3301_v42, %v1021_v19  ;;  %1506 = vperm.xlu0 %2803, %v3256_v7   ;;  %1598 = vmatpush.bf16.msrb.mxu3 %v2729_v18  ;;  %v3546_v18 = vld [vmem:[%s4028_s6] ss:$0 sm:$0xff] }
 0x13c   : > { %v1075_v24 = vadd.f32 %v3307_v44, %v1056_v21 }
 0x13e   : > { %vm1091_vm6 = vcmp.ge.f32.partialorder %v1075_v24, 0.0  ;;  %v1113_v26 = vmul.f32 %v3311_v48, %v1075_v24 }
 0x13f   : > { %v1023_v28 = vpop.f32.mrf.mxu0 }
 0x140   : > { %v1024_v31 = vadd.f32 %v3295_v38, %v1023_v28  ;;  %v1129_v33 = vsel %vm1091_vm6, %v1075_v24, %v1113_v26  ;;  %v1882_v26 = vld [vmem:[%s3372_s29 + $0x38] sm:$0xff]  ;;  %v1327_v28 = vpack.c.bf16 %v1312_v23, %v1311_v22 }
 0x141   : > { %v1142_v35 = vpack.c.bf16 %v1129_v33, %v1128_v32  ;;  %v1894_v29 = vpack.c.bf16 %v1882_v26, %v1881_v25  ;;  %v1323_v25 = vld [vmem:[%s3232_s5 + $0x60] sm:$0xff]  ;;  %v1324_v26 = vld [vmem:[%s3232_s5 + $0x68] sm:$0xff] }
 0x142   : > { %v1057_v39 = vmul.f32 %v3301_v42, %v1024_v31  ;;  %2806 = vset.pattern.permute.xlu0 %v2954_v37  ;;  %v1314_v37 = vld [vmem:[%s3232_s5 + $0x18] sm:$0xff] }
 0x143   : > { %2553 = vmatmul.msk.bf16.gmra.mxu1 %vm1167_vm2, %v1142_v35 }
 0x144   : > { %v1076_v43 = vadd.f32 %v3307_v44, %v1057_v39 }
 0x146   : > { %v1114_v49 = vmul.f32 %v3311_v48, %v1076_v43  ;;  %vm1092_vm7 = vcmp.ge.f32.partialorder %v1076_v43, 0.0  ;;  %1989 = vmatmul.bf16.gmra.mxu0 %v1894_v29 }
 0x147   : > { %v1025_v41 = vpop.f32.mrf.mxu0 }
 0x148   : > { %v1026_v45 = vadd.f32 %v3295_v38, %v1025_v41  ;;  %v1130_v57 = vsel %vm1092_vm7, %v1076_v43, %v1114_v49  ;;  %v1313_v43 = vld [vmem:[%s3232_s5 + $0x10] sm:$0xff]  ;;  %v1883_v49 = vld [vmem:[%s3372_s29 + $0x40] sm:$0xff] }
 0x149   : > { %v1328_v47 = vpack.c.bf16 %v1314_v37, %v1313_v43 }
 0x14a   : > { %v1058_v46 = vmul.f32 %v3301_v42, %v1026_v45 }
 0x14c   : > { %v1077_v50 = vadd.f32 %v3307_v44, %v1058_v46 }
 0x14e   : > { %vm1093_vm8 = vcmp.ge.f32.partialorder %v1077_v50, 0.0  ;;  %v1115_v51 = vmul.f32 %v3311_v48, %v1077_v50 }
 0x14f   : > { %v1028_v53 = vpop.f32.mrf.mxu0 }
 0x150   : > { %v1029_v56 = vadd.f32 %v3295_v38, %v1028_v53  ;;  %v1131_v58 = vsel %vm1093_vm8, %v1077_v50, %v1115_v51  ;;  %v1884_v50 = vld [vmem:[%s3372_s29 + $0x48] sm:$0xff] }
 0x151   : > { %v1143_v60 = vpack.c.bf16 %v1131_v58, %v1130_v57  ;;  %v1895_v54 = vpack.c.bf16 %v1884_v50, %v1883_v49 }
 0x152   : > { %v1059_v61 = vmul.f32 %v3301_v42, %v1029_v56 }
 0x153   : > { %2554 = vmatmul.msk.bf16.vlgmr.msra.gmra.mxu2 %vm1167_vm2, %v1143_v60 }
 0x154   : > { %v1078_v63 = vadd.f32 %v3307_v44, %v1059_v61 }
 0x156   : > { %v1116_v2 = vmul.f32 %v3311_v48, %v1078_v63  ;;  %vm1094_vm9 = vcmp.ge.f32.partialorder %v1078_v63, 0.0  ;;  %1994 = vmatmul.bf16.gmra.mxu0 %v1895_v54 }
 0x157   : > { %v1030_v62 = vpop.f32.mrf.mxu0 }
 0x158   : > { %v1031_v0 = vadd.f32 %v3295_v38, %v1030_v62  ;;  %v1132_v10 = vsel %vm1094_vm9, %v1078_v63, %v1116_v2  ;;  %v1315_v63 = vld [vmem:[%s3232_s5 + $0x20] sm:$0xff] }
 0x15a   : > { %v1060_v1 = vmul.f32 %v3301_v42, %v1031_v0  ;;  %v1316_v0 = vld [vmem:[%s3232_s5 + $0x28] sm:$0xff] }
 0x15b   : > { %v1329_v2 = vpack.c.bf16 %v1316_v0, %v1315_v63 }
 0x15c   : > { %v1079_v3 = vadd.f32 %v3307_v44, %v1060_v1 }
 0x15e   : > { %v1117_v4 = vmul.f32 %v3311_v48, %v1079_v3  ;;  %vm1095_vm10 = vcmp.ge.f32.partialorder %v1079_v3, 0.0 }
 0x15f   : > { %v1033_v5 = vpop.f32.mrf.mxu0 }
 0x160   : > { %v1034_v9 = vadd.f32 %v3295_v38, %v1033_v5  ;;  %v1133_v11 = vsel %vm1095_vm10, %v1079_v3, %v1117_v4  ;;  %v1885_v3 = vld [vmem:[%s3372_s29 + $0x50] sm:$0xff]  ;;  %v1886_v4 = vld [vmem:[%s3372_s29 + $0x58] sm:$0xff] }
 0x161   : > { %v1144_v13 = vpack.c.bf16 %v1133_v11, %v1132_v10  ;;  %v1896_v5 = vpack.c.bf16 %v1886_v4, %v1885_v3  ;;  %v1888_v10 = vld [vmem:[%s3372_s29 + $0x68] sm:$0xff] }
 0x162   : > { %v1061_v14 = vmul.f32 %v3301_v42, %v1034_v9  ;;  %v1887_v9 = vld [vmem:[%s3372_s29 + $0x60] sm:$0xff] }
 0x163   : > { %2555 = vmatmul.msk.bf16.gmra.mxu2 %vm1167_vm2, %v1144_v13  ;;  %v1897_v11 = vpack.c.bf16 %v1888_v10, %v1887_v9  ;;  %v1320_v13 = vld [vmem:[%s3232_s5 + $0x48] sm:$0xff] }
 0x164   : > { %v1080_v16 = vadd.f32 %v3307_v44, %v1061_v14  ;;  %v1889_v14 = vld [vmem:[%s3372_s29 + $0x70] sm:$0xff] }
 0x166   : > { %v1118_v20 = vmul.f32 %v3311_v48, %v1080_v16  ;;  %vm1096_vm11 = vcmp.ge.f32.partialorder %v1080_v16, 0.0  ;;  %1999 = vmatmul.bf16.gmra.mxu0 %v1896_v5 }
 0x167   : > { %v1035_v15 = vpop.f32.mrf.mxu0 }
 0x168   : > { %v1036_v17 = vadd.f32 %v3295_v38, %v1035_v15  ;;  %v1134_v7 = vsel %vm1096_vm11, %v1080_v16, %v1118_v20  ;;  %v1890_v15 = vld [vmem:[%s3372_s29 + $0x78] sm:$0xff]  ;;  %v1331_v16 = vpack.c.bf16 %v1320_v13, %v1319_v12 }
 0x169   : > { %v1322_v20 = vld [vmem:[%s3232_s5 + $0x58] sm:$0xff] }
 0x16a   : > { %v1062_v19 = vmul.f32 %v3301_v42, %v1036_v17  ;;  %v1898_v17 = vpack.c.bf16 %v1890_v15, %v1889_v14  ;;  %v3536_v12 = vld [vmem:[%s4027_s0] ss:$0 sm:$0xff] }
 0x16c   : > { %v1081_v21 = vadd.f32 %v3307_v44, %v1062_v19  ;;  %v1321_v19 = vld [vmem:[%s3232_s5 + $0x50] sm:$0xff] }
 0x16e   : > { %v1119_v24 = vmul.f32 %v3311_v48, %v1081_v21  ;;  %vm1097_vm12 = vcmp.ge.f32.partialorder %v1081_v21, 0.0 }
 0x16f   : > { %v1038_v27 = vpop.f32.mrf.mxu0 }
 0x170   : > { %v1039_v30 = vadd.f32 %v3295_v38, %v1038_v27  ;;  %v1135_v31 = vsel %vm1097_vm12, %v1081_v21, %v1119_v24  ;;  %v1332_v21 = vpack.c.bf16 %v1322_v20, %v1321_v19  ;;  %v2741_v24 = vld [vmem:[%s3967_s21 + $0x8] sm:$0xff]  ;;  %v2740_v27 = vld [vmem:[%s3967_s21] sm:$0xff] }
 0x171   : > { %v1145_v32 = vpack.c.bf16 %v1135_v31, %v1134_v7  ;;  %2162 = vmatpush.bf16.msra.mxu2 %v2741_v24  ;;  %v2728_v7 = vld [vmem:[%s3960_s14] sm:$0xff] }
 0x172   : > { %v1063_v33 = vmul.f32 %v3301_v42, %v1039_v30  ;;  %v3473_v30 = vpop.permute.xlu1 %2070  ;;  %1599 = vmatpush.bf16.msrb.mxu3 %v2728_v7 }
 0x173   : > { %2556 = vmatmul.msk.bf16.vlgmr.msra.gmra.mxu3 %vm1167_vm2, %v1145_v32  ;;  %1410 = vmatmul.bf16.vlgmr.msrb.gmra.mxu2 %v1327_v28  ;;  %v1333_v28 = vpack.c.bf16 %v1324_v26, %v1323_v25 }
 0x174   : > { %v1082_v35 = vadd.f32 %v3307_v44, %v1063_v33  ;;  %v3481_v33 = vld [vmem:[%s3964_s18] ss:$0 sm:$0xff] }
 0x175   : > { %2163 = vmatpush.bf16.msra.mxu2 %v2740_v27 }
 0x176   : > { %v1120_v40 = vmul.f32 %v3311_v48, %v1082_v35  ;;  %vm1098_vm13 = vcmp.ge.f32.partialorder %v1082_v35, 0.0  ;;  %2004 = vmatmul.bf16.gmra.mxu0 %v1897_v11 }
 0x177   : > { %v1040_v34 = vpop.f32.mrf.mxu0 }
 0x178   : > { %v1041_v36 = vadd.f32 %v3295_v38, %v1040_v34  ;;  %v1136_v52 = vsel %vm1098_vm13, %v1082_v35, %v1120_v40  ;;  %v3486_v34 = vld [vmem:[%s4025_s10] ss:$0 sm:$0xff]  ;;  %v1325_v40 = vld [vmem:[%s3232_s5 + $0x70] sm:$0xff]  ;;  %s2509_s10 = sshll.u32 %s3113_s25, 4 }
 0x179   : > { %p896_p7 = scmp.lt.s32.totalorder %s2509_s10, 31 }
 0x17a   : > { %v1064_v39 = vmul.f32 %v3301_v42, %v1041_v36  ;;  %v3498_v37 = vpop.permute.xlu1 %1260 }
 0x17b   : > { %s4043_s10 = smov (!%p896_p7, %s2509_s10), 31 }
 0x17c   : > { %v1083_v41 = vadd.f32 %v3307_v44, %v1064_v39  ;;  %v3493_v39 = vld [vmem:[%s3965_s19] ss:$0 sm:$0xff]  ;;  %s2510_s2 = sshll.u32 %s4043_s10, 3 }
 0x17e   : > { %v1121_v45 = vmul.f32 %v3311_v48, %v1083_v41  ;;  %vm1099_vm14 = vcmp.ge.f32.partialorder %v1083_v41, 0.0 }
 0x17f   : > { %v1043_v46 = vpop.f32.mrf.mxu0 }
 0x180   : > { %v1044_v51 = vadd.f32 %v3295_v38, %v1043_v46  ;;  %v1137_v53 = vsel %vm1099_vm14, %v1083_v41, %v1121_v45  ;;  %v1326_v41 = vld [vmem:[%s3232_s5 + $0x78] sm:$0xff] }
 0x181   : > { %v1146_v55 = vpack.c.bf16 %v1137_v53, %v1136_v52  ;;  %v1334_v49 = vpack.c.bf16 %v1326_v41, %v1325_v40  ;;  %v3506_v52 = vld [vmem:[%s4026_s7] ss:$0 sm:$0xff]  ;;  %s4036_s7 = sld [smem:[#allocation32_spill]] }
 0x182   : > { %v1065_v56 = vmul.f32 %v3301_v42, %v1044_v51 }
 0x183   : > { %2557 = vmatmul.msk.bf16.gmra.mxu3 %vm1167_vm2, %v1146_v55  ;;  %1415 = vmatmul.bf16.gmra.mxu2 %v1328_v47 }
 0x184   : > { %v1084_v58 = vadd.f32 %v3307_v44, %v1065_v56 }
 0x186   : > { %v1122_v61 = vmul.f32 %v3311_v48, %v1084_v58  ;;  %vm1100_vm15 = vcmp.ge.f32.partialorder %v1084_v58, 0.0  ;;  %2009 = vmatmul.bf16.gmra.mxu0 %v1898_v17 }
 0x187   : > { %v1045_v57 = vpop.f32.mrf.mxu0  ;;  %s3884_s5 = scalar_lea.vmem %s4036_s7, %s2510_s2 }
 0x188   : > { %v1046_v59 = vadd.f32 %v3295_v38, %v1045_v57  ;;  %v1138_v38 = vsel %vm1100_vm15, %v1084_v58, %v1122_v61 }
 0x18a   : > { %v1066_v60 = vmul.f32 %v3301_v42, %v1046_v59 }
 0x18c   : > { %v1085_v62 = vadd.f32 %v3307_v44, %v1066_v60 }
 0x18e   : > { %v1123_v1 = vmul.f32 %v3311_v48, %v1085_v62  ;;  %vm1101_vm0 = vcmp.ge.f32.partialorder %v1085_v62, 0.0  ;;  %v1330_v48 = vpack.c.bf16 %v1318_v8, %v1317_v6 }
 0x18f   : > { %v1975_v22 = vpop.f32.mrf.mxu0 }
 0x190   : > { %v1139_v42 = vsel %vm1101_vm0, %v1085_v62, %v1123_v1  ;;  %v1976_v36 = vadd.f32 %v3481_v33, %v1975_v22 }
 0x191   : > { %v1147_v44 = vpack.c.bf16 %v1139_v42, %v1138_v38 }
 0x192   : > { %v2018_v51 = vmul.f32 %v3493_v39, %v1976_v36 }
 0x193   : > { %2558 = vmatmul.msk.bf16.gmra.mxu3 %vm1167_vm2, %v1147_v44  ;;  %1420 = vmatmul.bf16.gmra.mxu2 %v1329_v2 }
 0x194   : > { %v2037_v58 = vadd.f32 %v3506_v52, %v2018_v51 }
 0x196   : > { %v2073_v62 = vmul.f32 %v3473_v30, %v2037_v58  ;;  %vm2053_vm4 = vcmp.ge.f32.partialorder %v2037_v58, 0.0 }
 0x197   : > { %v1977_v23 = vpop.f32.mrf.mxu0 }
 0x198   : > { %v1978_v43 = vadd.f32 %v3481_v33, %v1977_v23  ;;  %v2089_v1 = vsel %vm2053_vm4, %v2037_v58, %v2073_v62  ;;  %v3554_v23 = vld [vmem:[%s4029_s1] ss:$0 sm:$0xff] }
 0x19a   : > { %v2019_v53 = vmul.f32 %v3493_v39, %v1978_v43 }
 0x19c   : > { %v2038_v59 = vadd.f32 %v3506_v52, %v2019_v53 }
 0x19e   : > { %v2074_v63 = vmul.f32 %v3473_v30, %v2038_v59  ;;  %vm2054_vm5 = vcmp.ge.f32.partialorder %v2038_v59, 0.0 }
 0x1a0   : > { %v2090_v2 = vsel %vm2054_vm5, %v2038_v59, %v2074_v63 }
 0x1a1   : > { %v2105_v5 = vpack.c.bf16 %v2090_v2, %v2089_v1 }
 0x1a3   : > { %1425 = vmatmul.bf16.gmra.mxu2 %v1330_v48  ;;  %v1980_v29 = vpop.f32.mrf.mxu0 }
 0x1a4   : > { %v1981_v3 = vadd.f32 %v3481_v33, %v1980_v29 }
 0x1a6   : > { %v2020_v8 = vmul.f32 %v3493_v39, %v1981_v3 }
 0x1a8   : > { %v2039_v14 = vadd.f32 %v3506_v52, %v2020_v8 }
 0x1aa   : > { %v2075_v19 = vmul.f32 %v3473_v30, %v2039_v14  ;;  %vm2055_vm8 = vcmp.ge.f32.partialorder %v2039_v14, 0.0 }
 0x1ab   : > { %v1982_v32 = vpop.f32.mrf.mxu0 }
 0x1ac   : > { %v1983_v4 = vadd.f32 %v3481_v33, %v1982_v32  ;;  %v2091_v25 = vsel %vm2055_vm8, %v2039_v14, %v2075_v19  ;;  %v3560_v32 = vpop.permute.xlu0 %1506 }
 0x1ae   : > { %v2021_v48 = vmul.f32 %v3493_v39, %v1983_v4 }
 0x1b0   : > { %v2040_v15 = vadd.f32 %v3506_v52, %v2021_v48 }
 0x1b2   : > { %v2076_v20 = vmul.f32 %v3473_v30, %v2040_v15  ;;  %vm2056_vm9 = vcmp.ge.f32.partialorder %v2040_v15, 0.0 }
 0x1b3   : > { %1430 = vmatmul.bf16.gmra.mxu2 %v1331_v16  ;;  %v1985_v50 = vpop.f32.mrf.mxu0 }
 0x1b4   : > { %v1986_v24 = vadd.f32 %v3481_v33, %v1985_v50  ;;  %v2092_v26 = vsel %vm2056_vm9, %v2040_v15, %v2076_v20 }
 0x1bb   : > { %v1987_v61 = vpop.f32.mrf.mxu0 }
 0x1bc   : > { %v1988_v27 = vadd.f32 %v3481_v33, %v1987_v61 }
 0x1be   : > { %v2023_v36 = vmul.f32 %v3493_v39, %v1988_v27 }
 0x1c3   : > { %1435 = vmatmul.bf16.gmra.mxu2 %v1332_v21  ;;  %v1990_v6 = vpop.f32.mrf.mxu0 }
 0x1c4   : > { %v1991_v62 = vadd.f32 %v3481_v33, %v1990_v6 }
 0x1cb   : > { %v1992_v21 = vpop.f32.mrf.mxu0 }
 0x1cc   : > { %v1993_v1 = vadd.f32 %v3481_v33, %v1992_v21 }
 0x1d3   : > { %1440 = vmatmul.bf16.gmra.mxu2 %v1333_v28 }
 0x1d6   : > { %v1216_v31 = vpop.f32.mrf.mxu2 }
 0x1d7   : > { %v1217_v35 = vadd.f32 %v3486_v34, %v1216_v31  ;;  %v2106_v31 = vpack.c.bf16 %v2092_v26, %v2091_v25 }
 0x1d9   : > { %v1269_v46 = vmul.f32 %v3498_v37, %v1217_v35  ;;  %vm1247_vm1 = vcmp.ge.f32.partialorder %v1217_v35, 0.0 }
 0x1db   : > { %v3510_v55 = vsel %vm1247_vm1, %v1217_v35, %v1269_v46  ;;  %v2022_v35 = vmul.f32 %v3493_v39, %v1986_v24 }
 0x1dd   : > { %v2041_v46 = vadd.f32 %v3506_v52, %v2022_v35 }
 0x1de   : > { %v1218_v45 = vpop.f32.mrf.mxu2 }
 0x1df   : > { %v1219_v47 = vadd.f32 %v3486_v34, %v1218_v45  ;;  %v1995_v45 = vpop.f32.mrf.mxu0  ;;  %v2077_v58 = vmul.f32 %v3473_v30, %v2041_v46  ;;  %vm2057_vm12 = vcmp.ge.f32.partialorder %v2041_v46, 0.0 }
 0x1e0   : > { %v1996_v27 = vadd.f32 %v3481_v33, %v1995_v45 }
 0x1e1   : > { %vm1248_vm3 = vcmp.ge.f32.partialorder %v1219_v47, 0.0  ;;  %v1270_v54 = vmul.f32 %v3498_v37, %v1219_v47  ;;  %v2093_v63 = vsel %vm2057_vm12, %v2041_v46, %v2077_v58 }
 0x1e3   : > { %v3512_v56 = vsel %vm1248_vm3, %v1219_v47, %v1270_v54  ;;  %1445 = vmatmul.bf16.gmra.mxu2 %v1334_v49  ;;  %v2042_v47 = vadd.f32 %v3506_v52, %v2023_v36 }
 0x1e4   : > { %v1298_v57 = vpack.c.bf16 %v3512_v56, %v3510_v55 }
 0x1e5   : > { %v2078_v59 = vmul.f32 %v3473_v30, %v2042_v47  ;;  %vm2058_vm13 = vcmp.ge.f32.partialorder %v2042_v47, 0.0 }
 0x1e6   : > { %v1221_v60 = vpop.f32.mrf.mxu2 }
 0x1e7   : > { %v1222_v0 = vadd.f32 %v3486_v34, %v1221_v60  ;;  %v1997_v2 = vpop.f32.mrf.mxu0 }
 0x1e9   : > { %v1271_v42 = vmul.f32 %v3498_v37, %v1222_v0  ;;  %vm1249_vm6 = vcmp.ge.f32.partialorder %v1222_v0, 0.0 }
 0x1eb   : > { %v3528_v10 = vsel %vm1249_vm6, %v1222_v0, %v1271_v42  ;;  %v2094_v0 = vsel %vm2058_vm13, %v2042_v47, %v2078_v59 }
 0x1ec   : > { %v2107_v42 = vpack.c.bf16 %v2094_v0, %v2093_v63 }
 0x1ee   : > { %v1223_v38 = vpop.f32.mrf.mxu2 }
 0x1ef   : > { %v1224_v44 = vadd.f32 %v3486_v34, %v1223_v38  ;;  %v2000_v21 = vpop.f32.mrf.mxu0 }
 0x1f1   : > { %vm1250_vm7 = vcmp.ge.f32.partialorder %v1224_v44, 0.0  ;;  %v1272_v9 = vmul.f32 %v3498_v37, %v1224_v44 }
 0x1f3   : > { %v3530_v11 = vsel %vm1250_vm7, %v1224_v44, %v1272_v9  ;;  %2679 = vmatmul.msk.bf16.vlgmr.msra.gmra.mxu2 %vm1167_vm2, %v2105_v5  ;;  %v2024_v5 = vmul.f32 %v3493_v39, %v1991_v62  ;;  %v2025_v44 = vmul.f32 %v3493_v39, %v1993_v1 }
 0x1f4   : > { %v1299_v13 = vpack.c.bf16 %v3530_v11, %v3528_v10 }
 0x1f5   : > { %v2043_v9 = vadd.f32 %v3506_v52, %v2024_v5  ;;  %v2044_v14 = vadd.f32 %v3506_v52, %v2025_v44 }
 0x1f6   : > { %v1411_v16 = vpop.f32.mrf.mxu2 }
 0x1f7   : > { %v1412_v17 = vadd.f32 %v3536_v12, %v1411_v16  ;;  %v2080_v24 = vmul.f32 %v3473_v30, %v2044_v14  ;;  %vm2059_vm0 = vcmp.ge.f32.partialorder %v2043_v9, 0.0  ;;  %vm2060_vm1 = vcmp.ge.f32.partialorder %v2044_v14, 0.0  ;;  %v2002_v47 = vpop.f32.mrf.mxu0 }
 0x1f9   : > { %v1454_v22 = vmul.f32 %v3546_v18, %v1412_v17 }
 0x1fb   : > { %v1473_v29 = vadd.f32 %v3554_v23, %v1454_v22  ;;  %v2079_v22 = vmul.f32 %v3473_v30, %v2043_v9 }
 0x1fd   : > { %v1509_v43 = vmul.f32 %v3560_v32, %v1473_v29  ;;  %vm1489_vm10 = vcmp.ge.f32.partialorder %v1473_v29, 0.0 }
 0x1fe   : > { %v1413_v28 = vpop.f32.mrf.mxu2 }
 0x1ff   : > { %v1414_v7 = vadd.f32 %v3536_v12, %v1413_v28  ;;  %v1525_v53 = vsel %vm1489_vm10, %v1473_v29, %v1509_v43  ;;  %v2095_v28 = vsel %vm2059_vm0, %v2043_v9, %v2079_v22  ;;  %v2096_v29 = vsel %vm2060_vm1, %v2044_v14, %v2080_v24  ;;  %v2005_v1 = vpop.f32.mrf.mxu0 }
 0x201   : > { %v1455_v40 = vmul.f32 %v3546_v18, %v1414_v7  ;;  %v1998_v7 = vadd.f32 %v3481_v33, %v1997_v2  ;;  %v2001_v2 = vadd.f32 %v3481_v33, %v2000_v21 }
 0x203   : > { %v1474_v41 = vadd.f32 %v3554_v23, %v1455_v40  ;;  %2680 = vmatmul.msk.bf16.gmra.mxu2 %vm1167_vm2, %v2106_v31  ;;  %v2108_v40 = vpack.c.bf16 %v2096_v29, %v2095_v28  ;;  %v2027_v43 = vmul.f32 %v3493_v39, %v1998_v7  ;;  %v2006_v7 = vadd.f32 %v3481_v33, %v2005_v1 }
 0x205   : > { %vm1490_vm11 = vcmp.ge.f32.partialorder %v1474_v41, 0.0  ;;  %v1510_v49 = vmul.f32 %v3560_v32, %v1474_v41 }
 0x206   : > { %v1416_v50 = vpop.f32.mrf.mxu2 }
 0x207   : > { %v1417_v51 = vadd.f32 %v3536_v12, %v1416_v50  ;;  %v1526_v54 = vsel %vm1490_vm11, %v1474_v41, %v1510_v49  ;;  %v2026_v41 = vmul.f32 %v3493_v39, %v1996_v27 }
 0x208   : > { %v1541_v60 = vpack.c.bf16 %v1526_v54, %v1525_v53 }
 0x209   : > { %v1456_v61 = vmul.f32 %v3546_v18, %v1417_v51  ;;  %v2045_v50 = vadd.f32 %v3506_v52, %v2026_v41  ;;  %v2046_v51 = vadd.f32 %v3506_v52, %v2027_v43 }
 0x20a   : > { %2599 = vmatmul.msk.bf16.vlgmr.msrb.gmra.mxu3 %vm1167_vm2, %v1541_v60 }
 0x20b   : > { %v1475_v4 = vadd.f32 %v3554_v23, %v1456_v61  ;;  %v2081_v61 = vmul.f32 %v3473_v30, %v2045_v50  ;;  %v2082_v62 = vmul.f32 %v3473_v30, %v2046_v51  ;;  %vm2061_vm5 = vcmp.ge.f32.partialorder %v2045_v50, 0.0 }
 0x20c   : > { %vm2062_vm6 = vcmp.ge.f32.partialorder %v2046_v51, 0.0 }
 0x20d   : > { %v1511_v48 = vmul.f32 %v3560_v32, %v1475_v4  ;;  %vm1491_vm14 = vcmp.ge.f32.partialorder %v1475_v4, 0.0 }
 0x20e   : > { %v1418_v3 = vpop.f32.mrf.mxu2 }
 0x20f   : > { %v1419_v38 = vadd.f32 %v3536_v12, %v1418_v3  ;;  %v1527_v19 = vsel %vm1491_vm14, %v1475_v4, %v1511_v48  ;;  %v2097_v3 = vsel %vm2061_vm5, %v2045_v50, %v2081_v61  ;;  %v2098_v4 = vsel %vm2062_vm6, %v2046_v51, %v2082_v62 }
 0x210   : > { %v2028_v48 = vmul.f32 %v3493_v39, %v2001_v2 }
 0x211   : > { %v1457_v8 = vmul.f32 %v3546_v18, %v1419_v38  ;;  %v2003_v38 = vadd.f32 %v3481_v33, %v2002_v47 }
 0x213   : > { %v1476_v6 = vadd.f32 %v3554_v23, %v1457_v8  ;;  %2681 = vmatmul.msk.bf16.gmra.mxu2 %vm1167_vm2, %v2107_v42  ;;  %v2109_v8 = vpack.c.bf16 %v2098_v4, %v2097_v3 }
 0x215   : > { %vm1492_vm15 = vcmp.ge.f32.partialorder %v1476_v6, 0.0  ;;  %v1512_v15 = vmul.f32 %v3560_v32, %v1476_v6 }
 0x216   : > { %v1421_v16 = vpop.f32.mrf.mxu2 }
 0x217   : > { %v1422_v17 = vadd.f32 %v3536_v12, %v1421_v16  ;;  %v1528_v20 = vsel %vm1492_vm15, %v1476_v6, %v1512_v15  ;;  %v2029_v6 = vmul.f32 %v3493_v39, %v2003_v38  ;;  %v2047_v16 = vadd.f32 %v3506_v52, %v2028_v48 }
 0x218   : > { %v1542_v25 = vpack.c.bf16 %v1528_v20, %v1527_v19  ;;  %v2007_v20 = vpop.f32.mrf.mxu0 }
 0x219   : > { %v1458_v26 = vmul.f32 %v3546_v18, %v1422_v17  ;;  %v2048_v17 = vadd.f32 %v3506_v52, %v2029_v6  ;;  %vm2063_vm9 = vcmp.ge.f32.partialorder %v2047_v16, 0.0 }
 0x21a   : > { %2600 = vmatmul.msk.bf16.gmra.mxu3 %vm1167_vm2, %v1542_v25 }
 0x21b   : > { %v1477_v35 = vadd.f32 %v3554_v23, %v1458_v26  ;;  %v2083_v26 = vmul.f32 %v3473_v30, %v2047_v16  ;;  %v2084_v27 = vmul.f32 %v3473_v30, %v2048_v17  ;;  %vm2064_vm10 = vcmp.ge.f32.partialorder %v2048_v17, 0.0 }
 0x21d   : > { %v1513_v49 = vmul.f32 %v3560_v32, %v1477_v35  ;;  %vm1493_vm3 = vcmp.ge.f32.partialorder %v1477_v35, 0.0 }
 0x21e   : > { %v1423_v31 = vpop.f32.mrf.mxu2 }
 0x21f   : > { %v1424_v36 = vadd.f32 %v3536_v12, %v1423_v31  ;;  %v1529_v59 = vsel %vm1493_vm3, %v1477_v35, %v1513_v49  ;;  %v2099_v31 = vsel %vm2063_vm9, %v2047_v16, %v2083_v26  ;;  %v2100_v35 = vsel %vm2064_vm10, %v2048_v17, %v2084_v27 }
 0x220   : > { %v2010_v47 = vpop.f32.mrf.mxu0  ;;  %v2030_v49 = vmul.f32 %v3493_v39, %v2006_v7 }
 0x221   : > { %v1459_v46 = vmul.f32 %v3546_v18, %v1424_v36  ;;  %v2008_v36 = vadd.f32 %v3481_v33, %v2007_v20  ;;  %v2011_v38 = vadd.f32 %v3481_v33, %v2010_v47 }
 0x223   : > { %v1478_v45 = vadd.f32 %v3554_v23, %v1459_v46  ;;  %2682 = vmatmul.msk.bf16.gmra.mxu2 %vm1167_vm2, %v2108_v40  ;;  %v2110_v46 = vpack.c.bf16 %v2100_v35, %v2099_v31 }
 0x225   : > { %vm1494_vm4 = vcmp.ge.f32.partialorder %v1478_v45, 0.0  ;;  %v1514_v53 = vmul.f32 %v3560_v32, %v1478_v45 }
 0x226   : > { %v1426_v54 = vpop.f32.mrf.mxu2 }
 0x227   : > { %v1427_v58 = vadd.f32 %v3536_v12, %v1426_v54  ;;  %v1530_v60 = vsel %vm1494_vm4, %v1478_v45, %v1514_v53  ;;  %v2031_v45 = vmul.f32 %v3493_v39, %v2008_v36  ;;  %v2049_v54 = vadd.f32 %v3506_v52, %v2030_v49 }
 0x228   : > { %v1543_v63 = vpack.c.bf16 %v1530_v60, %v1529_v59  ;;  %v2012_v3 = vpop.f32.mrf.mxu0 }
 0x229   : > { %v1460_v0 = vmul.f32 %v3546_v18, %v1427_v58  ;;  %v2050_v58 = vadd.f32 %v3506_v52, %v2031_v45  ;;  %vm2065_vm13 = vcmp.ge.f32.partialorder %v2049_v54, 0.0 }
 0x22a   : > { %2601 = vmatmul.msk.bf16.gmra.mxu3 %vm1167_vm2, %v1543_v63 }
 0x22b   : > { %v1479_v5 = vadd.f32 %v3554_v23, %v1460_v0  ;;  %v2085_v0 = vmul.f32 %v3473_v30, %v2049_v54  ;;  %v2086_v1 = vmul.f32 %v3473_v30, %v2050_v58  ;;  %vm2066_vm14 = vcmp.ge.f32.partialorder %v2050_v58, 0.0 }
 0x22d   : > { %v1515_v14 = vmul.f32 %v3560_v32, %v1479_v5  ;;  %vm1495_vm7 = vcmp.ge.f32.partialorder %v1479_v5, 0.0 }
 0x22e   : > { %v1428_v42 = vpop.f32.mrf.mxu2 }
 0x22f   : > { %v1429_v44 = vadd.f32 %v3536_v12, %v1428_v42  ;;  %v1531_v24 = vsel %vm1495_vm7, %v1479_v5, %v1515_v14  ;;  %v2101_v42 = vsel %vm2065_vm13, %v2049_v54, %v2085_v0  ;;  %v2102_v5 = vsel %vm2066_vm14, %v2050_v58, %v2086_v1 }
 0x230   : > { %v2111_v14 = vpack.c.bf16 %v2102_v5, %v2101_v42 }
 0x231   : > { %v1461_v9 = vmul.f32 %v3546_v18, %v1429_v44  ;;  %v2013_v44 = vadd.f32 %v3481_v33, %v2012_v3 }
 0x233   : > { %v1480_v15 = vadd.f32 %v3554_v23, %v1461_v9  ;;  %2683 = vmatmul.msk.bf16.gmra.mxu2 %vm1167_vm2, %v2109_v8  ;;  %v2731_v8 = vld [vmem:[%s4030_s4 + $0x8] sm:$0xff]  ;;  %v2033_v16 = vmul.f32 %v3493_v39, %v2013_v44  ;;  %s4035_s4 = sld [smem:[#allocation30_spill]] }
 0x234   : > { %1743 = vmatpush.bf16.msrb.mxu1 %v2731_v8 }
 0x235   : > { %vm1496_vm8 = vcmp.ge.f32.partialorder %v1480_v15, 0.0  ;;  %v1516_v19 = vmul.f32 %v3560_v32, %v1480_v15 }
 0x236   : > { %v1431_v21 = vpop.f32.mrf.mxu2 }
 0x237   : > { %v1432_v22 = vadd.f32 %v3536_v12, %v1431_v21  ;;  %v1532_v25 = vsel %vm1496_vm8, %v1480_v15, %v1516_v19  ;;  %v2032_v15 = vmul.f32 %v3493_v39, %v2011_v38  ;;  %v3658_v19 = vpop.f32.mrf.mxu3 }
 0x238   : > { %v1544_v28 = vpack.c.bf16 %v1532_v25, %v1531_v24 }
 0x239   : > { %v1462_v29 = vmul.f32 %v3546_v18, %v1432_v22  ;;  %v2051_v21 = vadd.f32 %v3506_v52, %v2032_v15  ;;  %v2052_v22 = vadd.f32 %v3506_v52, %v2033_v16 }
 0x23a   : > { %2602 = vmatmul.msk.bf16.gmra.mxu3 %vm1167_vm2, %v1544_v28 }
 0x23b   : > { %v1481_v41 = vadd.f32 %v3554_v23, %v1462_v29  ;;  %v2087_v28 = vmul.f32 %v3473_v30, %v2051_v21  ;;  %v2088_v29 = vmul.f32 %v3473_v30, %v2052_v22  ;;  %vm2067_vm1 = vcmp.ge.f32.partialorder %v2051_v21, 0.0  ;;  %v2719_v30 = vld [vmem:[%s4032_s3 + $0x8] sm:$0xff] }
 0x23c   : > { %vm2068_vm3 = vcmp.ge.f32.partialorder %v2052_v22, 0.0  ;;  %1828 = vmatpush.bf16.msra.mxu3 %v2719_v30 }
 0x23d   : > { %v1517_v51 = vmul.f32 %v3560_v32, %v1481_v41  ;;  %vm1497_vm11 = vcmp.ge.f32.partialorder %v1481_v41, 0.0  ;;  %v2103_v31 = vsel %vm2067_vm1, %v2051_v21, %v2087_v28  ;;  %v2104_v35 = vsel %vm2068_vm3, %v2052_v22, %v2088_v29 }
 0x23e   : > { %v1433_v40 = vpop.f32.mrf.mxu2 }
 0x23f   : > { %v1434_v43 = vadd.f32 %v3536_v12, %v1433_v40  ;;  %v1533_v62 = vsel %vm1497_vm11, %v1481_v41, %v1517_v51  ;;  %v3671_v36 = vpop.f32.mrf.mxu3 }
 0x241   : > { %v1463_v50 = vmul.f32 %v3546_v18, %v1434_v43 }
 0x243   : > { %v1482_v53 = vadd.f32 %v3554_v23, %v1463_v50  ;;  %2684 = vmatmul.msk.bf16.gmra.mxu2 %vm1167_vm2, %v2110_v46  ;;  %v2112_v46 = vpack.c.bf16 %v2104_v35, %v2103_v31  ;;  %v2730_v50 = vld [vmem:[%s4031_s23] sm:$0xff] }
 0x244   : > { %1744 = vmatpush.bf16.msrb.mxu1 %v2730_v50 }
 0x245   : > { %v1518_v59 = vmul.f32 %v3560_v32, %v1482_v53  ;;  %vm1498_vm12 = vcmp.ge.f32.partialorder %v1482_v53, 0.0 }
 0x246   : > { %v1436_v60 = vpop.f32.mrf.mxu2 }
 0x247   : > { %v1437_v61 = vadd.f32 %v3536_v12, %v1436_v60  ;;  %v1534_v63 = vsel %vm1498_vm12, %v1482_v53, %v1518_v59  ;;  %v2718_v53 = vld [vmem:[%s4032_s3] sm:$0xff]  ;;  %v3689_v58 = vpop.f32.mrf.mxu3 }
 0x248   : > { %v1545_v2 = vpack.c.bf16 %v1534_v63, %v1533_v62  ;;  %1829 = vmatpush.bf16.msra.mxu3 %v2718_v53  ;;  %v1201_v62 = vpop.f32.mrf.mxu1 }
 0x249   : > { %v1464_v4 = vmul.f32 %v3546_v18, %v1437_v61 }
 0x24a   : > { %2603 = vmatmul.msk.bf16.gmra.mxu3 %vm1167_vm2, %v1545_v2 }
 0x24b   : > { %v1483_v6 = vadd.f32 %v3554_v23, %v1464_v4 }
 0x24d   : > { %v1519_v33 = vmul.f32 %v3560_v32, %v1483_v6  ;;  %vm1499_vm15 = vcmp.ge.f32.partialorder %v1483_v6, 0.0 }
 0x24e   : > { %v1438_v48 = vpop.f32.mrf.mxu2 }
 0x24f   : > { %v1439_v9 = vadd.f32 %v3536_v12, %v1438_v48  ;;  %v1535_v26 = vsel %vm1499_vm15, %v1483_v6, %v1519_v33  ;;  %v3696_v4 = vpop.f32.mrf.mxu3 }
 0x250   : > { %v1203_v42 = vpop.f32.mrf.mxu1 }
 0x251   : > { %v1465_v17 = vmul.f32 %v3546_v18, %v1439_v9  ;;  %v1204_v15 = vadd.f32 %v3486_v34, %v1203_v42 }
 0x253   : > { %v1484_v20 = vadd.f32 %v3554_v23, %v1465_v17  ;;  %2685 = vmatmul.msk.bf16.gmra.mxu2 %vm1167_vm2, %v2111_v14  ;;  %v1264_v16 = vmul.f32 %v3498_v37, %v1204_v15  ;;  %vm1242_vm8 = vcmp.ge.f32.partialorder %v1204_v15, 0.0 }
 0x255   : > { %v1520_v24 = vmul.f32 %v3560_v32, %v1484_v20  ;;  %vm1500_vm0 = vcmp.ge.f32.partialorder %v1484_v20, 0.0  ;;  %v1280_v17 = vsel %vm1242_vm8, %v1204_v15, %v1264_v16 }
 0x256   : > { %v1441_v25 = vpop.f32.mrf.mxu2 }
 0x257   : > { %v1442_v39 = vadd.f32 %v3536_v12, %v1441_v25  ;;  %v1536_v27 = vsel %vm1500_vm0, %v1484_v20, %v1520_v24  ;;  %v3703_v14 = vpop.f32.mrf.mxu3 }
 0x258   : > { %v1546_v7 = vpack.c.bf16 %v1536_v27, %v1535_v26 }
 0x259   : > { %v1466_v52 = vmul.f32 %v3546_v18, %v1442_v39  ;;  %v3719_v39 = vld [vmem:[%s4034_s16] ss:$0 sm:$0xff] }
 0x25a   : > { %2604 = vmatmul.msk.bf16.gmra.mxu3 %vm1167_vm2, %v1546_v7 }
 0x25b   : > { %v1485_v41 = vadd.f32 %v3554_v23, %v1466_v52 }
 0x25d   : > { %v1521_v49 = vmul.f32 %v3560_v32, %v1485_v41  ;;  %vm1501_vm4 = vcmp.ge.f32.partialorder %v1485_v41, 0.0 }
 0x25e   : > { %v1443_v40 = vpop.f32.mrf.mxu2 }
 0x25f   : > { %v1444_v43 = vadd.f32 %v3536_v12, %v1443_v40  ;;  %v1537_v60 = vsel %vm1501_vm4, %v1485_v41, %v1521_v49  ;;  %v3712_v33 = vpop.f32.mrf.mxu3 }
 0x261   : > { %v1467_v47 = vmul.f32 %v3546_v18, %v1444_v43 }
 0x263   : > { %v1486_v45 = vadd.f32 %v3554_v23, %v1467_v47  ;;  %2686 = vmatmul.msk.bf16.gmra.mxu2 %vm1167_vm2, %v2112_v46 }
 0x265   : > { %v1522_v51 = vmul.f32 %v3560_v32, %v1486_v45  ;;  %vm1502_vm5 = vcmp.ge.f32.partialorder %v1486_v45, 0.0 }
 0x266   : > { %v1446_v54 = vpop.f32.mrf.mxu2 }
 0x267   : > { %v1447_v59 = vadd.f32 %v3536_v12, %v1446_v54  ;;  %v1538_v61 = vsel %vm1502_vm5, %v1486_v45, %v1522_v51 }
 0x268   : > { %v1547_v63 = vpack.c.bf16 %v1538_v61, %v1537_v60 }
 0x269   : > { %v1468_v0 = vmul.f32 %v3546_v18, %v1447_v59 }
 0x26a   : > { %2605 = vmatmul.msk.bf16.gmra.mxu3 %vm1167_vm2, %v1547_v63 }
 0x26b   : > { %v1487_v2 = vadd.f32 %v3554_v23, %v1468_v0 }
 0x26d   : > { %v1523_v5 = vmul.f32 %v3560_v32, %v1487_v2  ;;  %vm1503_vm6 = vcmp.ge.f32.partialorder %v1487_v2, 0.0 }
 0x26e   : > { %v1448_v1 = vpop.f32.mrf.mxu2 }
 0x26f   : > { %v1449_v3 = vadd.f32 %v3536_v12, %v1448_v1  ;;  %v1539_v48 = vsel %vm1503_vm6, %v1487_v2, %v1523_v5  ;;  %v1206_v12 = vpop.f32.mrf.mxu1 }
 0x270   : > { %v1207_v26 = vadd.f32 %v3486_v34, %v1206_v12 }
 0x271   : > { %v1469_v38 = vmul.f32 %v3546_v18, %v1449_v3  ;;  %v1202_v18 = vadd.f32 %v3486_v34, %v1201_v62 }
 0x272   : > { %v1265_v7 = vmul.f32 %v3498_v37, %v1207_v26  ;;  %vm1243_vm11 = vcmp.ge.f32.partialorder %v1207_v26, 0.0 }
 0x273   : > { %v1488_v44 = vadd.f32 %v3554_v23, %v1469_v38  ;;  %v2743_v23 = vld [vmem:[%s4033_s9 + $0x8] sm:$0xff]  ;;  %vm1241_vm9 = vcmp.ge.f32.partialorder %v1202_v18, 0.0 }
 0x274   : > { %2307 = vmatpush.bf16.msra.mxu1 %v2743_v23  ;;  %v1281_v41 = vsel %vm1243_vm11, %v1207_v26, %v1265_v7 }
 0x275   : > { %v1524_v8 = vmul.f32 %v3560_v32, %v1488_v44  ;;  %vm1504_vm7 = vcmp.ge.f32.partialorder %v1488_v44, 0.0  ;;  %v1263_v32 = vmul.f32 %v3498_v37, %v1202_v18 }
 0x277   : > { %v1540_v6 = vsel %vm1504_vm7, %v1488_v44, %v1524_v8  ;;  %v1208_v20 = vpop.f32.mrf.mxu1  ;;  %v1279_v21 = vsel %vm1241_vm9, %v1202_v18, %v1263_v32  ;;  %v2742_v32 = vld [vmem:[%s4033_s9] sm:$0xff] }
 0x278   : > { %v1548_v9 = vpack.c.bf16 %v1540_v6, %v1539_v48  ;;  %v1295_v22 = vpack.c.bf16 %v1280_v17, %v1279_v21  ;;  %v1209_v24 = vadd.f32 %v3486_v34, %v1208_v20  ;;  %2308 = vmatpush.bf16.msra.mxu1 %v2742_v32 }
 0x27a   : > { %2606 = vmatmul.msk.bf16.gmra.mxu3 %vm1167_vm2, %v1548_v9  ;;  %v1266_v28 = vmul.f32 %v3498_v37, %v1209_v24  ;;  %vm1244_vm10 = vcmp.ge.f32.partialorder %v1209_v24, 0.0 }
 0x27c   : > { %v1282_v52 = vsel %vm1244_vm10, %v1209_v24, %v1266_v28 }
 0x27d   : > { %v1296_v43 = vpack.c.bf16 %v1282_v52, %v1281_v41 }
 0x27f   : > { %v1211_v27 = vpop.f32.mrf.mxu1 }
 0x280   : > { %v1212_v53 = vadd.f32 %v3486_v34, %v1211_v27  ;;  %v1227_v27 = vadd.f32 %v3486_v34, %v3658_v19 }
 0x282   : > { %v1267_v60 = vmul.f32 %v3498_v37, %v1212_v53  ;;  %vm1245_vm15 = vcmp.ge.f32.partialorder %v1212_v53, 0.0  ;;  %v1273_v10 = vmul.f32 %v3498_v37, %v1227_v27  ;;  %vm1251_vm8 = vcmp.ge.f32.partialorder %v1227_v27, 0.0 }
 0x284   : > { %v1283_v1 = vsel %vm1245_vm15, %v1212_v53, %v1267_v60  ;;  %v1289_v52 = vsel %vm1251_vm8, %v1227_v27, %v1273_v10 }
 0x287   : > { %v1213_v47 = vpop.f32.mrf.mxu1 }
 0x288   : > { %v1214_v50 = vadd.f32 %v3486_v34, %v1213_v47  ;;  %v1232_v47 = vadd.f32 %v3486_v34, %v3689_v58 }
 0x28a   : > { %2631 = vmatmul.msk.bf16.vlgmr.msra.gmra.mxu3 %vm1167_vm2, %v1295_v22  ;;  %v1268_v54 = vmul.f32 %v3498_v37, %v1214_v50  ;;  %vm1246_vm14 = vcmp.ge.f32.partialorder %v1214_v50, 0.0 }
 0x28c   : > { %v1284_v61 = vsel %vm1246_vm14, %v1214_v50, %v1268_v54 }
 0x28d   : > { %v1601_v25 = vpop.f32.mrf.mxu3  ;;  %v1297_v2 = vpack.c.bf16 %v1284_v61, %v1283_v1 }
 0x28e   : > { %v1602_v29 = vadd.f32 %v3719_v39, %v1601_v25  ;;  %v1229_v25 = vadd.f32 %v3486_v34, %v3671_v36 }
 0x290   : > { %v1657_v35 = vmul.f32 %v1602_v29, %v3498_v37  ;;  %vm1641_vm12 = vcmp.ge.f32.partialorder %v1602_v29, 0.0  ;;  %v1274_v28 = vmul.f32 %v3498_v37, %v1229_v25  ;;  %vm1252_vm7 = vcmp.ge.f32.partialorder %v1229_v25, 0.0 }
 0x292   : > { %v1673_v30 = vsel %vm1641_vm12, %v1602_v29, %v1657_v35  ;;  %v1290_v11 = vsel %vm1252_vm7, %v1229_v25, %v1274_v28  ;;  %vm1253_vm12 = vcmp.ge.f32.partialorder %v1232_v47, 0.0 }
 0x295   : > { %v1603_v31 = vpop.f32.mrf.mxu3 }
 0x296   : > { %v1604_v40 = vadd.f32 %v3719_v39, %v1603_v31  ;;  %v1300_v31 = vpack.c.bf16 %v1290_v11, %v1289_v52 }
 0x298   : > { %vm1642_vm13 = vcmp.ge.f32.partialorder %v1604_v40, 0.0  ;;  %v1658_v46 = vmul.f32 %v1604_v40, %v3498_v37 }
 0x29a   : > { %v1674_v49 = vsel %vm1642_vm13, %v1604_v40, %v1658_v46  ;;  %2632 = vmatmul.msk.bf16.gmra.mxu3 %vm1167_vm2, %v1296_v43  ;;  %v1234_v43 = vadd.f32 %v3486_v34, %v3696_v4 }
 0x29b   : > { %v1689_v45 = vpack.c.bf16 %v1674_v49, %v1673_v30 }
 0x29c   : > { %v1276_v30 = vmul.f32 %v3498_v37, %v1234_v43  ;;  %vm1254_vm11 = vcmp.ge.f32.partialorder %v1234_v43, 0.0 }
 0x29d   : > { %v1606_v51 = vpop.f32.mrf.mxu3  ;;  %2615 = vmatmul.msk.bf16.vlgmr.msrb.gmra.mxu1 %vm1167_vm2, %v1689_v45  ;;  %v1275_v45 = vmul.f32 %v3498_v37, %v1232_v47 }
 0x29e   : > { %v1607_v59 = vadd.f32 %v3719_v39, %v1606_v51  ;;  %v1292_v50 = vsel %vm1254_vm11, %v1234_v43, %v1276_v30 }
 0x29f   : > { %v1291_v54 = vsel %vm1253_vm12, %v1232_v47, %v1275_v45 }
 0x2a0   : > { %v1659_v63 = vmul.f32 %v1607_v59, %v3498_v37  ;;  %vm1643_vm0 = vcmp.ge.f32.partialorder %v1607_v59, 0.0  ;;  %v1301_v60 = vpack.c.bf16 %v1292_v50, %v1291_v54 }
 0x2a2   : > { %v1675_v38 = vsel %vm1643_vm0, %v1607_v59, %v1659_v63  ;;  %v2165_v59 = vpop.f32.mrf.mxu2 }
 0x2a5   : > { %v1608_v62 = vpop.f32.mrf.mxu3 }
 0x2a6   : > { %v1609_v0 = vadd.f32 %v3719_v39, %v1608_v62 }
 0x2a8   : > { %vm1644_vm1 = vcmp.ge.f32.partialorder %v1609_v0, 0.0  ;;  %v1660_v3 = vmul.f32 %v1609_v0, %v3498_v37 }
 0x2aa   : > { %2633 = vmatmul.msk.bf16.gmra.mxu3 %vm1167_vm2, %v1297_v2  ;;  %v1676_v42 = vsel %vm1644_vm1, %v1609_v0, %v1660_v3  ;;  %v1239_v0 = vadd.f32 %v3486_v34, %v3712_v33  ;;  %v1237_v2 = vadd.f32 %v3486_v34, %v3703_v14 }
 0x2ab   : > { %v1690_v5 = vpack.c.bf16 %v1676_v42, %v1675_v38  ;;  %v2167_v38 = vpop.f32.mrf.mxu2 }
 0x2ac   : > { %v1278_v3 = vmul.f32 %v3498_v37, %v1239_v0  ;;  %vm1256_vm15 = vcmp.ge.f32.partialorder %v1239_v0, 0.0  ;;  %vm1255_vm0 = vcmp.ge.f32.partialorder %v1237_v2, 0.0 }
 0x2ad   : > { %v1611_v44 = vpop.f32.mrf.mxu3  ;;  %2616 = vmatmul.msk.bf16.gmra.mxu1 %vm1167_vm2, %v1690_v5  ;;  %v1277_v5 = vmul.f32 %v3498_v37, %v1237_v2 }
 0x2ae   : > { %v1612_v8 = vadd.f32 %v3719_v39, %v1611_v44  ;;  %v1294_v44 = vsel %vm1256_vm15, %v1239_v0, %v1278_v3 }
 0x2b0   : > { %v1661_v6 = vmul.f32 %v1612_v8, %v3498_v37  ;;  %vm1645_vm3 = vcmp.ge.f32.partialorder %v1612_v8, 0.0 }
 0x2b2   : > { %v1677_v15 = vsel %vm1645_vm3, %v1612_v8, %v1661_v6  ;;  %v1293_v6 = vsel %vm1255_vm0, %v1237_v2, %v1277_v5 }
 0x2b5   : > { %v1613_v48 = vpop.f32.mrf.mxu3 }
 0x2b6   : > { %v1614_v9 = vadd.f32 %v3719_v39, %v1613_v48 }
 0x2b8   : > { %vm1646_vm4 = vcmp.ge.f32.partialorder %v1614_v9, 0.0  ;;  %v1662_v12 = vmul.f32 %v1614_v9, %v3498_v37 }
 0x2ba   : > { %2634 = vmatmul.msk.bf16.gmra.mxu3 %vm1167_vm2, %v1298_v57  ;;  %v1678_v18 = vsel %vm1646_vm4, %v1614_v9, %v1662_v12  ;;  %v1302_v9 = vpack.c.bf16 %v1294_v44, %v1293_v6 }
 0x2bb   : > { %v1691_v23 = vpack.c.bf16 %v1678_v18, %v1677_v15  ;;  %v2170_v15 = vpop.f32.mrf.mxu2 }
 0x2bd   : > { %v1616_v16 = vpop.f32.mrf.mxu3  ;;  %2617 = vmatmul.msk.bf16.gmra.mxu1 %vm1167_vm2, %v1691_v23 }
 0x2be   : > { %v1617_v17 = vadd.f32 %v3719_v39, %v1616_v16 }
 0x2c0   : > { %v1663_v21 = vmul.f32 %v1617_v17, %v3498_v37  ;;  %vm1647_vm5 = vcmp.ge.f32.partialorder %v1617_v17, 0.0 }
 0x2c2   : > { %v1679_v57 = vsel %vm1647_vm5, %v1617_v17, %v1663_v21 }
 0x2c3   : > { %v2172_v32 = vpop.f32.mrf.mxu2 }
 0x2c5   : > { %v1618_v20 = vpop.f32.mrf.mxu3 }
 0x2c6   : > { %v1619_v55 = vadd.f32 %v3719_v39, %v1618_v20 }
 0x2c8   : > { %vm1648_vm6 = vcmp.ge.f32.partialorder %v1619_v55, 0.0  ;;  %v1664_v56 = vmul.f32 %v1619_v55, %v3498_v37 }
 0x2ca   : > { %2635 = vmatmul.msk.bf16.gmra.mxu3 %vm1167_vm2, %v1299_v13  ;;  %v1680_v22 = vsel %vm1648_vm6, %v1619_v55, %v1664_v56 }
 0x2cb   : > { %v1692_v24 = vpack.c.bf16 %v1680_v22, %v1679_v57  ;;  %v2175_v25 = vpop.f32.mrf.mxu2 }
 0x2cd   : > { %v1621_v26 = vpop.f32.mrf.mxu3  ;;  %2618 = vmatmul.msk.bf16.gmra.mxu1 %vm1167_vm2, %v1692_v24  ;;  %v3804_v24 = vld [vmem:[%s4035_s4] ss:$0 sm:$0xff] }
 0x2ce   : > { %v1622_v29 = vadd.f32 %v3719_v39, %v1621_v26  ;;  %v2166_v26 = vadd.f32 %v3804_v24, %v2165_v59  ;;  %v2168_v27 = vadd.f32 %v3804_v24, %v2167_v38  ;;  %v2173_v52 = vadd.f32 %v3804_v24, %v2172_v32 }
 0x2cf   : > { %v2176_v45 = vadd.f32 %v3804_v24, %v2175_v25 }
 0x2d0   : > { %v1665_v7 = vmul.f32 %v1622_v29, %v3498_v37  ;;  %vm1649_vm9 = vcmp.ge.f32.partialorder %v1622_v29, 0.0  ;;  %v2222_v28 = vmul.f32 %v2168_v27, %v3498_v37  ;;  %vm2205_vm6 = vcmp.ge.f32.partialorder %v2166_v26, 0.0 }
 0x2d1   : > { %vm2206_vm7 = vcmp.ge.f32.partialorder %v2168_v27, 0.0  ;;  %vm2209_vm11 = vcmp.ge.f32.partialorder %v2176_v45, 0.0 }
 0x2d2   : > { %v1681_v35 = vsel %vm1649_vm9, %v1622_v29, %v1665_v7  ;;  %v2238_v10 = vsel %vm2206_vm7, %v2168_v27, %v2222_v28  ;;  %vm2208_vm9 = vcmp.ge.f32.partialorder %v2173_v52, 0.0 }
 0x2d3   : > { %v2177_v11 = vpop.f32.mrf.mxu2 }
 0x2d5   : > { %v1623_v13 = vpop.f32.mrf.mxu3 }
 0x2d6   : > { %v1624_v36 = vadd.f32 %v3719_v39, %v1623_v13 }
 0x2d8   : > { %vm1650_vm10 = vcmp.ge.f32.partialorder %v1624_v36, 0.0  ;;  %v1666_v19 = vmul.f32 %v1624_v36, %v3498_v37 }
 0x2da   : > { %2636 = vmatmul.msk.bf16.gmra.mxu3 %vm1167_vm2, %v1300_v31  ;;  %v1682_v40 = vsel %vm1650_vm10, %v1624_v36, %v1666_v19  ;;  %v2171_v36 = vadd.f32 %v3804_v24, %v2170_v15 }
 0x2db   : > { %v1693_v41 = vpack.c.bf16 %v1682_v40, %v1681_v35  ;;  %v2180_v19 = vpop.f32.mrf.mxu2  ;;  %v2224_v40 = vmul.f32 %v2173_v52, %v3498_v37 }
 0x2dc   : > { %v2223_v35 = vmul.f32 %v2171_v36, %v3498_v37  ;;  %vm2207_vm8 = vcmp.ge.f32.partialorder %v2171_v36, 0.0 }
 0x2dd   : > { %v1626_v46 = vpop.f32.mrf.mxu3  ;;  %2619 = vmatmul.msk.bf16.gmra.mxu1 %vm1167_vm2, %v1693_v41  ;;  %v2240_v43 = vsel %vm2208_vm9, %v2173_v52, %v2224_v40 }
 0x2de   : > { %v1627_v49 = vadd.f32 %v3719_v39, %v1626_v46  ;;  %v2239_v41 = vsel %vm2207_vm8, %v2171_v36, %v2223_v35 }
 0x2df   : > { %v2254_v47 = vpack.c.bf16 %v2240_v43, %v2239_v41 }
 0x2e0   : > { %v1667_v53 = vmul.f32 %v1627_v49, %v3498_v37  ;;  %vm1651_vm13 = vcmp.ge.f32.partialorder %v1627_v49, 0.0 }
 0x2e2   : > { %v1683_v61 = vsel %vm1651_vm13, %v1627_v49, %v1667_v53  ;;  %v2178_v49 = vadd.f32 %v3804_v24, %v2177_v11  ;;  %v2225_v53 = vmul.f32 %v2176_v45, %v3498_v37 }
 0x2e3   : > { %v2182_v30 = vpop.f32.mrf.mxu2 }
 0x2e4   : > { %vm2210_vm10 = vcmp.ge.f32.partialorder %v2178_v49, 0.0  ;;  %v2241_v59 = vsel %vm2209_vm11, %v2176_v45, %v2225_v53 }
 0x2e5   : > { %v1628_v51 = vpop.f32.mrf.mxu3 }
 0x2e6   : > { %v1629_v4 = vadd.f32 %v3719_v39, %v1628_v51  ;;  %v2226_v51 = vmul.f32 %v2178_v49, %v3498_v37 }
 0x2e8   : > { %vm1652_vm14 = vcmp.ge.f32.partialorder %v1629_v4, 0.0  ;;  %v1668_v58 = vmul.f32 %v1629_v4, %v3498_v37  ;;  %v2242_v54 = vsel %vm2210_vm10, %v2178_v49, %v2226_v51 }
 0x2ea   : > { %2637 = vmatmul.msk.bf16.gmra.mxu3 %vm1167_vm2, %v1301_v60  ;;  %v1684_v62 = vsel %vm1652_vm14, %v1629_v4, %v1668_v58  ;;  %v2255_v58 = vpack.c.bf16 %v2242_v54, %v2241_v59 }
 0x2eb   : > { %v1694_v63 = vpack.c.bf16 %v1684_v62, %v1683_v61  ;;  %v2185_v4 = vpop.f32.mrf.mxu2  ;;  %v2183_v61 = vadd.f32 %v3804_v24, %v2182_v30 }
 0x2ed   : > { %v1631_v1 = vpop.f32.mrf.mxu3  ;;  %2620 = vmatmul.msk.bf16.gmra.mxu1 %vm1167_vm2, %v1694_v63  ;;  %v2181_v63 = vadd.f32 %v3804_v24, %v2180_v19  ;;  %vm2212_vm12 = vcmp.ge.f32.partialorder %v2183_v61, 0.0 }
 0x2ee   : > { %v1632_v42 = vadd.f32 %v3719_v39, %v1631_v1  ;;  %v2228_v1 = vmul.f32 %v2183_v61, %v3498_v37 }
 0x2ef   : > { %v2227_v2 = vmul.f32 %v2181_v63, %v3498_v37  ;;  %vm2211_vm13 = vcmp.ge.f32.partialorder %v2181_v63, 0.0 }
 0x2f0   : > { %v1669_v48 = vmul.f32 %v1632_v42, %v3498_v37  ;;  %vm1653_vm1 = vcmp.ge.f32.partialorder %v1632_v42, 0.0  ;;  %v2244_v3 = vsel %vm2212_vm12, %v2183_v61, %v2228_v1 }
 0x2f1   : > { %v2243_v38 = vsel %vm2211_vm13, %v2181_v63, %v2227_v2 }
 0x2f2   : > { %v1685_v14 = vsel %vm1653_vm1, %v1632_v42, %v1669_v48  ;;  %v2256_v5 = vpack.c.bf16 %v2244_v3, %v2243_v38  ;;  %v2186_v48 = vadd.f32 %v3804_v24, %v2185_v4 }
 0x2f3   : > { %v2187_v62 = vpop.f32.mrf.mxu2 }
 0x2f4   : > { %vm2213_vm15 = vcmp.ge.f32.partialorder %v2186_v48, 0.0 }
 0x2f5   : > { %v1633_v8 = vpop.f32.mrf.mxu3 }
 0x2f6   : > { %v1634_v33 = vadd.f32 %v3719_v39, %v1633_v8  ;;  %v2188_v8 = vadd.f32 %v3804_v24, %v2187_v62 }
 0x2f8   : > { %vm1654_vm3 = vcmp.ge.f32.partialorder %v1634_v33, 0.0  ;;  %v1670_v34 = vmul.f32 %v1634_v33, %v3498_v37  ;;  %v2230_v6 = vmul.f32 %v2188_v8, %v3498_v37  ;;  %vm2214_vm14 = vcmp.ge.f32.partialorder %v2188_v8, 0.0 }
 0x2fa   : > { %2638 = vmatmul.msk.bf16.gmra.mxu3 %vm1167_vm2, %v1302_v9  ;;  %v1686_v12 = vsel %vm1654_vm3, %v1634_v33, %v1670_v34  ;;  %v2229_v34 = vmul.f32 %v2186_v48, %v3498_v37 }
 0x2fb   : > { %v1695_v18 = vpack.c.bf16 %v1686_v12, %v1685_v14  ;;  %v2190_v44 = vpop.f32.mrf.mxu2  ;;  %v2246_v14 = vsel %vm2214_vm14, %v2188_v8, %v2230_v6 }
 0x2fc   : > { %v2245_v12 = vsel %vm2213_vm15, %v2186_v48, %v2229_v34  ;;  %v2191_v32 = vadd.f32 %v3804_v24, %v2190_v44 }
 0x2fd   : > { %v1636_v23 = vpop.f32.mrf.mxu3  ;;  %2621 = vmatmul.msk.bf16.gmra.mxu1 %vm1167_vm2, %v1695_v18  ;;  %v2257_v18 = vpack.c.bf16 %v2246_v14, %v2245_v12 }
 0x2fe   : > { %v1637_v16 = vadd.f32 %v3719_v39, %v1636_v23  ;;  %vm2215_vm1 = vcmp.ge.f32.partialorder %v2191_v32, 0.0 }
 0x300   : > { %v1671_v20 = vmul.f32 %v1637_v16, %v3498_v37  ;;  %vm1655_vm4 = vcmp.ge.f32.partialorder %v1637_v16, 0.0 }
 0x302   : > { %v1687_v56 = vsel %vm1655_vm4, %v1637_v16, %v1671_v20 }
 0x303   : > { %v2192_v9 = vpop.f32.mrf.mxu2 }
 0x304   : > { %v2193_v16 = vadd.f32 %v3804_v24, %v2192_v9 }
 0x305   : > { %v1638_v17 = vpop.f32.mrf.mxu3 }
 0x306   : > { %v1639_v21 = vadd.f32 %v3719_v39, %v1638_v17  ;;  %v2221_v39 = vmul.f32 %v2166_v26, %v3498_v37  ;;  %v2232_v20 = vmul.f32 %v2193_v16, %v3498_v37  ;;  %vm2216_vm0 = vcmp.ge.f32.partialorder %v2193_v16, 0.0 }
 0x308   : > { %vm1656_vm5 = vcmp.ge.f32.partialorder %v1639_v21, 0.0  ;;  %v1672_v55 = vmul.f32 %v1639_v21, %v3498_v37  ;;  %v2237_v29 = vsel %vm2205_vm6, %v2166_v26, %v2221_v39 }
 0x309   : > { %v2253_v7 = vpack.c.bf16 %v2238_v10, %v2237_v29 }
 0x30a   : > { %v1688_v57 = vsel %vm1656_vm5, %v1639_v21, %v1672_v55  ;;  %v2231_v21 = vmul.f32 %v2191_v32, %v3498_v37  ;;  %v2248_v55 = vsel %vm2216_vm0, %v2193_v16, %v2232_v20 }
 0x30b   : > { %v1696_v22 = vpack.c.bf16 %v1688_v57, %v1687_v56  ;;  %v2195_v23 = vpop.f32.mrf.mxu2 }
 0x30c   : > { %v2247_v57 = vsel %vm2215_vm1, %v2191_v32, %v2231_v21  ;;  %v2196_v27 = vadd.f32 %v3804_v24, %v2195_v23 }
 0x30d   : > { %2622 = vmatmul.msk.bf16.gmra.mxu1 %vm1167_vm2, %v1696_v22  ;;  %v2258_v25 = vpack.c.bf16 %v2248_v55, %v2247_v57  ;;  %v1831_v36 = vpop.f32.mrf.mxu3 }
 0x30e   : > { %v2233_v10 = vmul.f32 %v2196_v27, %v3498_v37  ;;  %vm2217_vm4 = vcmp.ge.f32.partialorder %v2196_v27, 0.0 }
 0x313   : > { %v2197_v56 = vpop.f32.mrf.mxu2 }
 0x314   : > { %v2198_v26 = vadd.f32 %v3804_v24, %v2197_v56 }
 0x315   : > { %v1833_v30 = vpop.f32.mrf.mxu3 }
 0x316   : > { %v2234_v29 = vmul.f32 %v2198_v26, %v3498_v37  ;;  %vm2218_vm3 = vcmp.ge.f32.partialorder %v2198_v26, 0.0 }
 0x318   : > { %v2250_v11 = vsel %vm2218_vm3, %v2198_v26, %v2234_v29 }
 0x31a   : > { %v3811_v13 = vpop.f32.mrf.mxu1 }
 0x31b   : > { %v2200_v28 = vpop.f32.mrf.mxu2 }
 0x31c   : > { %v2201_v41 = vadd.f32 %v3804_v24, %v2200_v28 }
 0x31d   : > { %2695 = vmatmul.msk.bf16.vlgmr.msra.gmra.mxu1 %vm1167_vm2, %v2253_v7  ;;  %v2249_v7 = vsel %vm2217_vm4, %v2196_v27, %v2233_v10  ;;  %v1836_v54 = vpop.f32.mrf.mxu3 }
 0x31e   : > { %v2259_v19 = vpack.c.bf16 %v2250_v11, %v2249_v7  ;;  %v2235_v49 = vmul.f32 %v2201_v41, %v3498_v37  ;;  %vm2219_vm6 = vcmp.ge.f32.partialorder %v2201_v41, 0.0 }
 0x320   : > { %v2251_v51 = vsel %vm2219_vm6, %v2201_v41, %v2235_v49 }
 0x322   : > { %v3816_v31 = vpop.f32.mrf.mxu1 }
 0x323   : > { %v2202_v35 = vpop.f32.mrf.mxu2  ;;  %v1834_v62 = vadd.f32 %v1833_v30, %v3816_v31 }
 0x324   : > { %v2203_v40 = vadd.f32 %v3804_v24, %v2202_v35 }
 0x325   : > { %v1838_v59 = vpop.f32.mrf.mxu3 }
 0x326   : > { %vm2220_vm5 = vcmp.ge.f32.partialorder %v2203_v40, 0.0 }
 0x32a   : > { %v3820_v46 = vpop.f32.mrf.mxu1 }
 0x32d   : > { %2696 = vmatmul.msk.bf16.gmra.mxu1 %vm1167_vm2, %v2254_v47  ;;  %v2236_v47 = vmul.f32 %v2203_v40, %v3498_v37  ;;  %v1841_v63 = vpop.f32.mrf.mxu3 }
 0x32f   : > { %v2252_v45 = vsel %vm2220_vm5, %v2203_v40, %v2236_v47 }
 0x330   : > { %v2260_v4 = vpack.c.bf16 %v2252_v45, %v2251_v51 }
 0x332   : > { %v3825_v50 = vpop.f32.mrf.mxu1 }
 0x333   : > { %v1839_v44 = vadd.f32 %v1838_v59, %v3825_v50 }
 0x33a   : > { %v3829_v60 = vpop.f32.mrf.mxu1 }
 0x33b   : > { %v1842_v6 = vadd.f32 %v1841_v63, %v3829_v60 }
 0x33d   : > { %2697 = vmatmul.msk.bf16.gmra.mxu1 %vm1167_vm2, %v2255_v58  ;;  %v1832_v58 = vadd.f32 %v1831_v36, %v3811_v13  ;;  %v1837_v13 = vadd.f32 %v1836_v54, %v3820_v46 }
 0x342   : > { %v3834_v0 = vpop.f32.mrf.mxu1 }
 0x34a   : > { %v3838_v42 = vpop.f32.mrf.mxu1 }
 0x34d   : > { %2698 = vmatmul.msk.bf16.gmra.mxu1 %vm1167_vm2, %v2256_v5  ;;  %v1843_v5 = vpop.f32.mrf.mxu3 }
 0x34e   : > { %v1844_v14 = vadd.f32 %v1843_v5, %v3834_v0 }
 0x352   : > { %v3843_v33 = vpop.f32.mrf.mxu1 }
 0x355   : > { %v1846_v31 = vpop.f32.mrf.mxu3 }
 0x356   : > { %v1847_v50 = vadd.f32 %v1846_v31, %v3838_v42 }
 0x35a   : > { %v3847_v15 = vpop.f32.mrf.mxu1 }
 0x35d   : > { %2699 = vmatmul.msk.bf16.gmra.mxu1 %vm1167_vm2, %v2257_v18  ;;  %v1848_v46 = vpop.f32.mrf.mxu3 }
 0x35e   : > { %v1849_v60 = vadd.f32 %v1848_v46, %v3843_v33 }
 0x362   : > { %v3852_v17 = vpop.f32.mrf.mxu1 }
 0x365   : > { %v1851_v23 = vpop.f32.mrf.mxu3 }
 0x366   : > { %v1852_v0 = vadd.f32 %v1851_v23, %v3847_v15 }
 0x36a   : > { %v3856_v22 = vpop.f32.mrf.mxu1 }
 0x36d   : > { %2700 = vmatmul.msk.bf16.gmra.mxu1 %vm1167_vm2, %v2258_v25  ;;  %v1853_v55 = vpop.f32.mrf.mxu3 }
 0x36e   : > { %v1854_v25 = vadd.f32 %v1853_v55, %v3852_v17 }
 0x372   : > { %v3861_v39 = vpop.f32.mrf.mxu1 }
 0x375   : > { %v1856_v42 = vpop.f32.mrf.mxu3 }
 0x376   : > { %v1857_v28 = vadd.f32 %v1856_v42, %v3856_v22 }
 0x37a   : > { %v3865_v52 = vpop.f32.mrf.mxu1 }
 0x37d   : > { %2701 = vmatmul.msk.bf16.gmra.mxu1 %vm1167_vm2, %v2259_v19  ;;  %v1858_v33 = vpop.f32.mrf.mxu3 }
 0x37e   : > { %v1859_v15 = vadd.f32 %v1858_v33, %v3861_v39 }
 0x382   : > { %v3870_v43 = vpop.f32.mrf.mxu1 }
 0x385   : > { %v1861_v11 = vpop.f32.mrf.mxu3 }
 0x386   : > { %v1862_v17 = vadd.f32 %v1861_v11, %v3865_v52 }
 0x38a   : > { %v3874_v53 = vpop.f32.mrf.mxu1 }
 0x38d   : > { %2702 = vmatmul.msk.bf16.gmra.mxu1 %vm1167_vm2, %v2260_v4  ;;  %v1863_v40 = vpop.f32.mrf.mxu3 }
 0x38e   : > { %v1864_v22 = vadd.f32 %v1863_v40, %v3870_v43 }
 0x392   : > { %v3878_v24 = vpop.f32.mrf.mxu1 }
 0x395   : > { %v1866_v39 = vpop.f32.mrf.mxu3 }
 0x396   : > { %v1867_v30 = vadd.f32 %v1866_v39, %v3874_v53 }
 0x39a   : > { %v2310_v37 = vpop.f32.mrf.mxu1 }
 0x39b   : > { %v2350_v61 = vadd.f32 %v2310_v37, %v1832_v58 }
 0x39d   : > { %2366 = vst.msk [vmem:[%s3884_s5] sm:$0xff] %vm1167_vm2, %v2350_v61  ;;  %v1868_v52 = vpop.f32.mrf.mxu3 }
 0x39e   : > { %v1869_v51 = vadd.f32 %v1868_v52, %v3878_v24 }
 0x3a2   : > { %v2312_v1 = vpop.f32.mrf.mxu1 }
 0x3a3   : > { %v2351_v2 = vadd.f32 %v2312_v1, %v1834_v62 }
 0x3a5   : > { %2367 = vst.msk [vmem:[%s3884_s5 + $0x8] sm:$0xff] %vm1167_vm2, %v2351_v2 }
 0x3aa   : > { %v2315_v3 = vpop.f32.mrf.mxu1 }
 0x3ab   : > { %v2352_v38 = vadd.f32 %v2315_v3, %v1837_v13 }
 0x3ad   : > { %2368 = vst.msk [vmem:[%s3884_s5 + $0x10] sm:$0xff] %vm1167_vm2, %v2352_v38 }
 0x3b2   : > { %v2317_v8 = vpop.f32.mrf.mxu1 }
 0x3b3   : > { %v2353_v48 = vadd.f32 %v2317_v8, %v1839_v44 }
 0x3b5   : > { %2369 = vst.msk [vmem:[%s3884_s5 + $0x18] sm:$0xff] %vm1167_vm2, %v2353_v48 }
 0x3ba   : > { %v2320_v9 = vpop.f32.mrf.mxu1 }
 0x3bb   : > { %v2354_v34 = vadd.f32 %v2320_v9, %v1842_v6 }
 0x3bd   : > { %2370 = vst.msk [vmem:[%s3884_s5 + $0x20] sm:$0xff] %vm1167_vm2, %v2354_v34 }
 0x3c2   : > { %v2322_v12 = vpop.f32.mrf.mxu1 }
 0x3c3   : > { %v2355_v18 = vadd.f32 %v2322_v12, %v1844_v14 }
 0x3c5   : > { %2371 = vst.msk [vmem:[%s3884_s5 + $0x28] sm:$0xff] %vm1167_vm2, %v2355_v18 }
 0x3ca   : > { %v2325_v16 = vpop.f32.mrf.mxu1 }
 0x3cb   : > { %v2356_v32 = vadd.f32 %v2325_v16, %v1847_v50 }
 0x3cd   : > { %2372 = vst.msk [vmem:[%s3884_s5 + $0x30] sm:$0xff] %vm1167_vm2, %v2356_v32 }
 0x3d2   : > { %v2327_v20 = vpop.f32.mrf.mxu1 }
 0x3d3   : > { %v2357_v21 = vadd.f32 %v2327_v20, %v1849_v60 }
 0x3d5   : > { %2373 = vst.msk [vmem:[%s3884_s5 + $0x38] sm:$0xff] %vm1167_vm2, %v2357_v21 }
 0x3da   : > { %v2330_v56 = vpop.f32.mrf.mxu1 }
 0x3db   : > { %v2358_v57 = vadd.f32 %v2330_v56, %v1852_v0 }
 0x3dd   : > { %2374 = vst.msk [vmem:[%s3884_s5 + $0x40] sm:$0xff] %vm1167_vm2, %v2358_v57 }
 0x3e2   : > { %v2332_v26 = vpop.f32.mrf.mxu1 }
 0x3e3   : > { %v2359_v27 = vadd.f32 %v2332_v26, %v1854_v25 }
 0x3e5   : > { %2375 = vst.msk [vmem:[%s3884_s5 + $0x48] sm:$0xff] %vm1167_vm2, %v2359_v27 }
 0x3ea   : > { %v2335_v29 = vpop.f32.mrf.mxu1 }
 0x3eb   : > { %v2360_v10 = vadd.f32 %v2335_v29, %v1857_v28 }
 0x3ed   : > { %2376 = vst.msk [vmem:[%s3884_s5 + $0x50] sm:$0xff] %vm1167_vm2, %v2360_v10 }
 0x3f2   : > { %v2337_v7 = vpop.f32.mrf.mxu1 }
 0x3f3   : > { %v2361_v36 = vadd.f32 %v2337_v7, %v1859_v15 }
 0x3f5   : > { %2377 = vst.msk [vmem:[%s3884_s5 + $0x58] sm:$0xff] %vm1167_vm2, %v2361_v36 }
 0x3fa   : > { %v2340_v19 = vpop.f32.mrf.mxu1 }
 0x3fb   : > { %v2362_v35 = vadd.f32 %v2340_v19, %v1862_v17 }
 0x3fd   : > { %2378 = vst.msk [vmem:[%s3884_s5 + $0x60] sm:$0xff] %vm1167_vm2, %v2362_v35 }
 0x402   : > { %v2342_v41 = vpop.f32.mrf.mxu1 }
 0x403   : > { %v2363_v47 = vadd.f32 %v2342_v41, %v1864_v22 }
 0x405   : > { %2379 = vst.msk [vmem:[%s3884_s5 + $0x68] sm:$0xff] %vm1167_vm2, %v2363_v47 }
 0x40a   : > { %v2345_v49 = vpop.f32.mrf.mxu1 }
 0x40b   : > { %v2364_v45 = vadd.f32 %v2345_v49, %v1867_v30 }
 0x40d   : > { %2380 = vst.msk [vmem:[%s3884_s5 + $0x70] sm:$0xff] %vm1167_vm2, %v2364_v45 }
 0x412   : > { %v2347_v4 = vpop.f32.mrf.mxu1 }
 0x413   : > { %v2365_v54 = vadd.f32 %v2347_v4, %v1869_v51 }
 0x415   : > { %2381 = vst.msk [vmem:[%s3884_s5 + $0x78] sm:$0xff] %vm1167_vm2, %v2365_v54 }
 0x416 PF: > { %s4037_s4 = sld [smem:[#allocation11_spill]]  ;;  %s4040_s7 = smov %s2941_s28 }
 0x417   : > { %s4038_s25 = sld [smem:[#allocation10_spill]] }
 0x418   : > { %s4039_s8 = sld [smem:[#allocation12_spill]] }
 0x41c   : > { %p41_p8 = scmp.ge.s32.totalorder %s4037_s4, 4  }
 0x41d   : > { %s4041_s28 = smov %s4038_s25 }
 0x41e   :  { %43 = sbr.rel (!%p41_p8) target bundleno = 26 (0x1a), region = 188 }
 0x423   :  { %2404 = vsyncpa [#allocation4], 1 }
 0x424   :  { %2406 = vsyncpa [#allocation4 + $0x1], 1 }
 0x425   :  { %2407 = vsyncpa [#allocation6], 1 }
 0x426   :  { %2409 = vsyncpa [#allocation6 + $0x1], 1 }

</bundles_post_ra>
